<compile_context>
chip_gen: v7x
topology: tpu7x:2x2x1
jax: 0.10.0
libtpu: 0.0.40
codegen_flags: <defaults>
</compile_context>

<pallas_src>
import jax
import jax.numpy as jnp
from jax.experimental import pallas as pl
from jax.experimental.pallas import tpu as pltpu

FEATURE_DIM = 4
MAX_LEN = 300
IN_DIM = MAX_LEN * FEATURE_DIM          # 1200
HIDDEN = 512
OUT_DIM = 1
MAX_TILE_B = 1024                       # upper bound on the batch tile


def _round_up(n, m):
    return ((n + m - 1) // m) * m


def _pick_tile_b(batch):
    """Batch tile: big enough to hide per-grid-step overhead, small enough to avoid
    padding waste on small batches, and (when the batch allows) an even-ish tile
    count so v7x's two TensorCores both get work on the parallel batch axis."""
    if batch <= 512:
        return max(8, _round_up(batch, 8))            # single, minimally padded tile
    n_tiles = max(2, -(-batch // MAX_TILE_B))          # >= 2 tiles, each <= 1024 rows
    return min(MAX_TILE_B, _round_up(-(-batch // n_tiles), 8))


def _disc_kernel(x_ref, w1_ref, b1_ref, w2_ref, b2_ref, o_ref):
    # x:  (TILE_B, IN_DIM) f32      w1: (IN_DIM, HIDDEN) bf16
    # b1: (1, HIDDEN) f32           w2: (1, HIDDEN) f32 (lane-major row vector)
    # b2: (1, 1) f32                o:  (TILE_B, 1) f32
    # Cast x to bf16 on the VPU (hidden under the MXU); accumulate in f32.
    x_bf = x_ref[...].astype(jnp.bfloat16)
    h = jnp.dot(x_bf, w1_ref[...], preferred_element_type=jnp.float32)
    h = h + b1_ref[...]
    # LeakyReLU(0.2): max(h, 0.2*h) is identical for slope in (0, 1).
    h = jnp.maximum(h, 0.2 * h)
    # Second "Linear(512, 1)" as VPU multiply + cross-lane (XLU) reduction,
    # avoiding a 128x-padded (512, 1) MXU operand.
    z = jnp.sum(h * w2_ref[...], axis=-1, keepdims=True) + b2_ref[...]
    # Exact sigmoid: exp on the EUP; the divide over a (TILE_B, 1) tile is negligible.
    o_ref[...] = 1.0 / (1.0 + jnp.exp(-z))


def prepare_params(w1, b1, w2, b2):
    """One-time parameter prep (hoisted out of the per-call path; redo only when the
    weights change).
      w1: (IN_DIM, HIDDEN)  -- transpose of PyTorch Linear(1200, 512).weight
      b1: (HIDDEN,) or (1, HIDDEN)
      w2: (HIDDEN,) or (1, HIDDEN)  -- PyTorch Linear(512, 1).weight layout
      b2: scalar / (1,) / (1, 1)
    """
    w1_p = jnp.asarray(w1, jnp.bfloat16).reshape(IN_DIM, HIDDEN)
    b1_p = jnp.asarray(b1, jnp.float32).reshape(1, HIDDEN)
    w2_p = jnp.asarray(w2, jnp.float32).reshape(1, HIDDEN)
    b2_p = jnp.asarray(b2, jnp.float32).reshape(1, 1)
    return w1_p, b1_p, w2_p, b2_p


def discriminator_forward(x, params):
    """x: any shape whose trailing dims flatten to IN_DIM (e.g. (B, 300, 4)), float.
    params: output of prepare_params(). Returns (B, 1) float32 probabilities."""
    w1_p, b1_p, w2_p, b2_p = params
    x2d = x.reshape(-1, IN_DIM)                 # view only; stays f32, cast in-kernel
    batch = x2d.shape[0]

    tile_b = _pick_tile_b(batch)
    n_tiles = pl.cdiv(batch, tile_b)

    out = pl.pallas_call(
        _disc_kernel,
        out_shape=jax.ShapeDtypeStruct((batch, OUT_DIM), jnp.float32),
        grid=(n_tiles,),
        in_specs=[
            pl.BlockSpec((tile_b, IN_DIM), lambda i: (i, 0)),    # x: streamed per tile
            pl.BlockSpec((IN_DIM, HIDDEN), lambda i: (0, 0)),    # w1: VMEM-resident
            pl.BlockSpec((1, HIDDEN), lambda i: (0, 0)),         # b1: VMEM-resident
            pl.BlockSpec((1, HIDDEN), lambda i: (0, 0)),         # w2: VMEM-resident
            pl.BlockSpec((1, 1), lambda i: (0, 0)),              # b2: VMEM-resident
        ],
        out_specs=pl.BlockSpec((tile_b, OUT_DIM), lambda i: (i, 0)),
        compiler_params=pltpu.CompilerParams(
            dimension_semantics=("parallel",),
            vmem_limit_bytes=48 << 20,   # 1024-row f32 x double-buffer > v5e's 16 MiB default
        ),
    )(x2d, w1_p, b1_p, w2_p, b2_p)
    return out


def init_params(key):
    """Deterministic init mimicking PyTorch nn.Linear default (uniform +/- 1/sqrt(fan_in)).
    w1 stored transposed as (in_features, out_features); w2 stored as (1, HIDDEN)."""
    k1, k2, k3, k4 = jax.random.split(key, 4)
    bound1 = 1.0 / jnp.sqrt(jnp.float32(IN_DIM))
    bound2 = 1.0 / jnp.sqrt(jnp.float32(HIDDEN))
    w1 = jax.random.uniform(k1, (IN_DIM, HIDDEN), jnp.float32, -bound1, bound1)
    b1 = jax.random.uniform(k2, (1, HIDDEN), jnp.float32, -bound1, bound1)
    w2 = jax.random.uniform(k3, (1, HIDDEN), jnp.float32, -bound2, bound2)
    b2 = jax.random.uniform(k4, (1, 1), jnp.float32, -bound2, bound2)
    return w1, b1, w2, b2


def _reference_forward(x, w1, b1, w2, b2):
    x2d = x.reshape(-1, IN_DIM).astype(jnp.float32)
    h = x2d @ w1 + b1.reshape(1, HIDDEN)
    h = jnp.where(h > 0, h, 0.2 * h)
    z = h @ w2.reshape(1, HIDDEN).T + b2.reshape(1, 1)
    return jax.nn.sigmoid(z)


if __name__ == "__main__":
    key = jax.random.PRNGKey(0)
    kx, kp = jax.random.split(key)

    # Small example batch: (batch=2, seq=MAX_LEN, features=FEATURE_DIM); the GAN trainer
    # feeds sequences of shape (B, 300, 4), and forward flattens to (B, 1200).
    batch = 2
    x = jax.random.normal(kx, (batch, MAX_LEN, FEATURE_DIM), jnp.float32)

    w1, b1, w2, b2 = init_params(kp)
    params = prepare_params(w1, b1, w2, b2)      # one-time weight prep

    out = discriminator_forward(x, params)
    out = jax.block_until_ready(out)

    # Sanity check vs. pure-f32 JAX reference (bf16 matmul inputs => loosened tolerance).
    ref = _reference_forward(x, w1, b1, w2, b2)
    assert out.shape == (batch, 1), out.shape
    assert bool(jnp.all(jnp.isfinite(out))), out
    assert jnp.allclose(out, ref, atol=2e-2, rtol=2e-2), (out, ref)

    print("KERNEL_OK")
</pallas_src>

<mosaic_0001>
module attributes {stable_mosaic.version = 11 : i64} {
  func.func @_disc_kernel(%arg0: i32, %arg1: memref<8x1200xf32, #tpu.memory_space<vmem>>, %arg2: memref<1200x512xbf16, #tpu.memory_space<vmem>>, %arg3: memref<1x512xf32, #tpu.memory_space<vmem>>, %arg4: memref<1x512xf32, #tpu.memory_space<vmem>>, %arg5: memref<1x1xf32, #tpu.memory_space<vmem>>, %arg6: memref<8x1xf32, #tpu.memory_space<vmem>>) attributes {dimension_semantics = [#tpu.dimension_semantics<parallel>], iteration_bounds = array<i64: 1>, scalar_prefetch = 0 : i64, scratch_operands = 0 : i64, tpu.core_type = #tpu.core_type<tc>, window_params = [{transform_indices = @transform_0, window_bounds = array<i64: 8, 1200>}, {pipeline_mode = #tpu.pipeline_mode<synchronous>, transform_indices = @transform_1, window_bounds = array<i64: 1200, 512>}, {pipeline_mode = #tpu.pipeline_mode<synchronous>, transform_indices = @transform_2, window_bounds = array<i64: 1, 512>}, {pipeline_mode = #tpu.pipeline_mode<synchronous>, transform_indices = @transform_3, window_bounds = array<i64: 1, 512>}, {pipeline_mode = #tpu.pipeline_mode<synchronous>, transform_indices = @transform_4, window_bounds = array<i64: 1, 1>}, {transform_indices = @transform_5, window_bounds = array<i64: 8, 1>}]} {
    %c0 = arith.constant 0 : index
    %c0_0 = arith.constant 0 : index
    %0 = vector.load %arg1[%c0, %c0_0] : memref<8x1200xf32, #tpu.memory_space<vmem>>, vector<8x1200xf32>
    %1 = arith.truncf %0 : vector<8x1200xf32> to vector<8x1200xbf16>
    %c0_1 = arith.constant 0 : index
    %c0_2 = arith.constant 0 : index
    %2 = vector.load %arg2[%c0_1, %c0_2] : memref<1200x512xbf16, #tpu.memory_space<vmem>>, vector<1200x512xbf16>
    %cst = arith.constant dense<0.000000e+00> : vector<8x512xf32>
    %3 = tpu.matmul %1, %2, %cst {dimension_numbers = #tpu.dot_dimension_numbers<[1], [0], [0], [1], [0, 0, 1, 1], [], []>} : vector<8x1200xbf16>, vector<1200x512xbf16>, vector<8x512xf32> -> vector<8x512xf32>
    %c0_3 = arith.constant 0 : index
    %c0_4 = arith.constant 0 : index
    %4 = vector.load %arg3[%c0_3, %c0_4] : memref<1x512xf32, #tpu.memory_space<vmem>>, vector<1x512xf32>
    %5 = vector.broadcast %4 : vector<1x512xf32> to vector<8x512xf32>
    %6 = arith.addf %3, %5 : vector<8x512xf32>
    %cst_5 = arith.constant 2.000000e-01 : f32
    %7 = vector.broadcast %cst_5 : f32 to vector<8x512xf32>
    %8 = arith.mulf %7, %6 : vector<8x512xf32>
    %9 = arith.maximumf %6, %8 : vector<8x512xf32>
    %c0_6 = arith.constant 0 : index
    %c0_7 = arith.constant 0 : index
    %10 = vector.load %arg4[%c0_6, %c0_7] : memref<1x512xf32, #tpu.memory_space<vmem>>, vector<1x512xf32>
    %11 = vector.broadcast %10 : vector<1x512xf32> to vector<8x512xf32>
    %12 = arith.mulf %9, %11 : vector<8x512xf32>
    %cst_8 = arith.constant dense<0.000000e+00> : vector<8xf32>
    %13 = vector.multi_reduction <add>, %12, %cst_8 [1] : vector<8x512xf32> to vector<8xf32>
    %14 = vector.shape_cast %13 : vector<8xf32> to vector<8x1xf32>
    %c0_9 = arith.constant 0 : index
    %c0_10 = arith.constant 0 : index
    %15 = vector.load %arg5[%c0_9, %c0_10] : memref<1x1xf32, #tpu.memory_space<vmem>>, vector<1x1xf32>
    %16 = vector.broadcast %15 : vector<1x1xf32> to vector<8x1xf32>
    %17 = arith.addf %14, %16 : vector<8x1xf32>
    %cst_11 = arith.constant 0.000000e+00 : f32
    %18 = vector.broadcast %cst_11 : f32 to vector<8x1xf32>
    %19 = arith.subf %18, %17 : vector<8x1xf32>
    %20 = math.exp %19 : vector<8x1xf32>
    %cst_12 = arith.constant 1.000000e+00 : f32
    %21 = vector.broadcast %cst_12 : f32 to vector<8x1xf32>
    %22 = arith.addf %21, %20 : vector<8x1xf32>
    %cst_13 = arith.constant 1.000000e+00 : f32
    %23 = vector.broadcast %cst_13 : f32 to vector<8x1xf32>
    %24 = arith.divf %23, %22 : vector<8x1xf32>
    %c0_14 = arith.constant 0 : index
    %c0_15 = arith.constant 0 : index
    %25 = vector.load %arg6[%c0_14, %c0_15] : memref<8x1xf32, #tpu.memory_space<vmem>>, vector<8x1xf32>
    tpu.vector_store %arg6[%c0_14, %c0_15], %24 {strides = array<i32>} : memref<8x1xf32, #tpu.memory_space<vmem>>, vector<8x1xf32>,
    return
  }
  func.func @transform_0(%arg0: i32) -> (i32, i32) {
    %c0_i32 = arith.constant 0 : i32
    %c0_i32_0 = arith.constant 0 : i32
    return %arg0, %c0_i32 : i32, i32
  }
  func.func @transform_1(%arg0: i32) -> (i32, i32) {
    %c0_i32 = arith.constant 0 : i32
    %c0_i32_0 = arith.constant 0 : i32
    %c0_i32_1 = arith.constant 0 : i32
    return %c0_i32, %c0_i32_0 : i32, i32
  }
  func.func @transform_2(%arg0: i32) -> (i32, i32) {
    %c0_i32 = arith.constant 0 : i32
    %c0_i32_0 = arith.constant 0 : i32
    %c0_i32_1 = arith.constant 0 : i32
    return %c0_i32, %c0_i32_0 : i32, i32
  }
  func.func @transform_3(%arg0: i32) -> (i32, i32) {
    %c0_i32 = arith.constant 0 : i32
    %c0_i32_0 = arith.constant 0 : i32
    %c0_i32_1 = arith.constant 0 : i32
    return %c0_i32, %c0_i32_0 : i32, i32
  }
  func.func @transform_4(%arg0: i32) -> (i32, i32) {
    %c0_i32 = arith.constant 0 : i32
    %c0_i32_0 = arith.constant 0 : i32
    %c0_i32_1 = arith.constant 0 : i32
    return %c0_i32, %c0_i32_0 : i32, i32
  }
  func.func @transform_5(%arg0: i32) -> (i32, i32) {
    %c0_i32 = arith.constant 0 : i32
    %c0_i32_0 = arith.constant 0 : i32
    return %arg0, %c0_i32 : i32, i32
  }
}

</mosaic_0001>

<bundles_post_ra>
// kernel: tpu_custom_call.1
= control target key start
LH: loop header
LB: loop body
LE: loop exit
PB: predicated region body
PF: predicated region fallthrough
CT: control target
= control target key end

     0   :  { %s3595_s0 = inlined_call_operand.hbm [shape: f32[2,1200], index: 0, kind: input, shape index: {}]   ;;  %s3596_s1 = inlined_call_operand.hbm [shape: bf16[1200,512], index: 1, kind: input, shape index: {}]   ;;  %s3597_s2 = inlined_call_operand.hbm [shape: f32[1,512], index: 2, kind: input, shape index: {}]   ;;  %s3598_s3 = inlined_call_operand.hbm [shape: f32[1,512], index: 3, kind: input, shape index: {}]   ;;  %s3599_s4 = inlined_call_operand.<no memory space> [shape: f32[1,1], index: 4, kind: input, shape index: {}]   ;;  %s3600_s5 = inlined_call_operand.vmem [shape: f32[2,1], index: 5, kind: output, shape index: {}]  }
   0x1   :  { %v10_v0 = vstv %s3599_s4 }
   0x2   :  { %11 = vst [vmem:[#allocation2] sm:$0x1] %v10_v0 }
   0x3   :  { %12 = vsyncpa [#allocation4], 0 }
   0x4   :  { %13 = vsyncpa [#allocation6], 0 }
   0x5   :  { %14 = vsyncpa [#allocation9], 0 }
   0x6   :  { %19 = vsyncadd [#allocation4], 960  ;;  %s3451_s20 = smov [#allocation5]   ;;  %s3357_s24 = scalar_lea.hbm %s3596_s1, 38400 }
   0x7   :  { %s32_s21 = sshll.u32 %s3451_s20, 4  ;;  %p3358_p0 = scmp.ne.s32.totalorder %s3596_s1, %s3357_s24  ;;  %s33_s21 = int_to_ptr.vmem [resolvable:$true] %s32_s21 }
   0x8   :  { %p3361_p1 = scmp.lt.u32.totalorder %s3357_s24, %s3596_s1 }
   0xa   :  { %p3363_p2 = pnand %p3361_p1, %p3358_p0 }
   0xc   :  { %3366 = shalt.err (!%p3363_p2)
}
   0xd   :  { %s3367_s4 = scalar_lea.vmem %s33_s21, 38400  ;;  %p3372_p4 = scmp.lt.s32.totalorder %s33_s21, %s33_s21 }
   0xe   :  { %p3368_p3 = scmp.ne.s32.totalorder %s33_s21, %s3367_s4  ;;  %p3373_p5 = scmp.lt.s32.totalorder %s3367_s4, %s3367_s4 }
  0x10   :  { %p3374_p6 = por %p3373_p5, %p3372_p4 }
  0x12   :  { %p3375_p7 = pnand %p3374_p6, %p3368_p3 }
  0x14   :  { %3378 = shalt.err (!%p3375_p7)
}
  0x15   :  { %s3452_s29 = smov 256   ;;  %s3453_s30 = smov 16  }
  0x16   :  { %38 = dma.hbm_to_vmem [thread:$0]  %s3596_s1, 38400, %s33_s21, [#allocation6], %s3452_s29, %s3452_s29, %s3453_s30  }
  0x17   :  { %s3454_s8 = smov [#allocation3]   ;;  %s3379_s12 = scalar_lea.hbm %s3595_s0, 320 }
  0x18   :  { %s20_s9 = sshll.u32 %s3454_s8, 4  ;;  %p3380_p8 = scmp.ne.s32.totalorder %s3595_s0, %s3379_s12  ;;  %s21_s9 = int_to_ptr.vmem [resolvable:$true] %s20_s9 }
  0x19   :  { %p3383_p9 = scmp.lt.u32.totalorder %s3379_s12, %s3595_s0 }
  0x1b   :  { %p3385_p10 = pnand %p3383_p9, %p3380_p8 }
  0x1d   :  { %3388 = shalt.err (!%p3385_p10)
}
  0x1e   :  { %s3389_s17 = scalar_lea.vmem %s21_s9, 320  ;;  %s3393_s1 = scalar_lea.vmem %s21_s9, 1280 }
  0x1f   :  { %p3390_p11 = scmp.ne.s32.totalorder %s21_s9, %s3389_s17  ;;  %p3394_p12 = scmp.lt.s32.totalorder %s21_s9, %s21_s9 }
  0x20   :  { %p3395_p13 = scmp.lt.s32.totalorder %s3393_s1, %s3389_s17 }
  0x22   :  { %p3396_p0 = por %p3395_p13, %p3394_p12 }
  0x24   :  { %p3397_p1 = pnand %p3396_p0, %p3390_p11 }
  0x26   :  { %3400 = shalt.err (!%p3397_p1)
}
  0x27   :  { %s3455_s18 = smov 320   ;;  %s3456_s19 = smov 20  }
  0x28   :  { %26 = dma.hbm_to_vmem [thread:$0]  %s3595_s0, 320, %s21_s9, [#allocation4], %s3455_s18, %s3455_s18, %s3456_s19  }
  0x29   :  { %s3457_s22 = smov [#allocation7]   ;;  %s3458_s24 = smov [#allocation8]  }
  0x2a   :  { %s45_s23 = sshll.u32 %s3457_s22, 4  ;;  %s55_s25 = sshll.u32 %s3458_s24, 4  ;;  %s46_s23 = int_to_ptr.vmem [resolvable:$true] %s45_s23  ;;  %s56_s25 = int_to_ptr.vmem [resolvable:$true] %s55_s25 }
  0x2b   :  { %s3401_s28 = scalar_lea.hbm %s3597_s2, 64 }
  0x2c   :  { %p3402_p2 = scmp.ne.s32.totalorder %s3597_s2, %s3401_s28  ;;  %p3405_p3 = scmp.lt.u32.totalorder %s3401_s28, %s3597_s2 }
  0x2e   :  { %p3407_p4 = pnand %p3405_p3, %p3402_p2 }
  0x30   :  { %3410 = shalt.err (!%p3407_p4)
}
  0x31   :  { %s3411_s0 = scalar_lea.vmem %s46_s23, 64  ;;  %p3416_p6 = scmp.lt.s32.totalorder %s46_s23, %s46_s23 }
  0x32   :  { %p3412_p5 = scmp.ne.s32.totalorder %s46_s23, %s3411_s0  ;;  %p3417_p7 = scmp.lt.s32.totalorder %s3411_s0, %s3411_s0 }
  0x34   :  { %p3418_p8 = por %p3417_p7, %p3416_p6 }
  0x36   :  { %p3419_p9 = pnand %p3418_p8, %p3412_p5 }
  0x38   :  { %3422 = shalt.err (!%p3419_p9)
}
  0x39   :  { %48 = dma.hbm_to_vmem [thread:$0]  %s3597_s2, 64, %s46_s23, [#allocation6]  }
  0x3a   :  { %s3423_s11 = scalar_lea.hbm %s3598_s3, 64 }
  0x3b   :  { %p3424_p10 = scmp.ne.s32.totalorder %s3598_s3, %s3423_s11  ;;  %p3427_p11 = scmp.lt.u32.totalorder %s3423_s11, %s3598_s3 }
  0x3d   :  { %p3429_p12 = pnand %p3427_p11, %p3424_p10 }
  0x3f   :  { %3432 = shalt.err (!%p3429_p12)
}
  0x40   :  { %s3433_s16 = scalar_lea.vmem %s56_s25, 64  ;;  %p3438_p0 = scmp.lt.s32.totalorder %s56_s25, %s56_s25 }
  0x41   :  { %p3434_p13 = scmp.ne.s32.totalorder %s56_s25, %s3433_s16  ;;  %p3439_p1 = scmp.lt.s32.totalorder %s3433_s16, %s3433_s16 }
  0x43   :  { %p3440_p2 = por %p3439_p1, %p3438_p0 }
  0x45   :  { %p3441_p3 = pnand %p3440_p2, %p3434_p13 }
  0x47   :  { %3444 = shalt.err (!%p3441_p3)
}
  0x48   :  { %58 = dma.hbm_to_vmem [thread:$0]  %s3598_s3, 64, %s56_s25, [#allocation9]  }
  0x49   :  { %3445 = dma.done.wait [#allocation4], 1280  }
  0x4a   :  { %3446 = vsyncadd [#allocation4], 4294966016 }
  0x4b   :  { %3447 = dma.done.wait [#allocation6], 38464  }
  0x4c   :  { %3448 = vsyncadd [#allocation6], 4294928832 }
  0x4d   :  { %3449 = dma.done.wait [#allocation9], 64  }
  0x4e   :  { %3450 = vsyncadd [#allocation9], 4294967232  ;;  %v2889_v1 = vld [vmem:[#allocation5 + $0x4] ss:$16 sps:$4 sm:$0xff]   ;;  %v2891_v2 = vld [vmem:[#allocation5 + $0xc] ss:$16 sps:$4 sm:$0xff]   ;;  %v105_v41 = vlaneseq }
  0x4f   :  { %2034 = vmatprep.subr.bf16.mxu0 %v2889_v1  ;;  %v2893_v3 = vld [vmem:[#allocation5] ss:$16 sps:$4 sm:$0xff]   ;;  %v2894_v4 = vld [vmem:[#allocation5 + $0x8] ss:$16 sps:$4 sm:$0xff]   ;;  %2239 = vmatprep.subr.bf16.mxu1 %v2891_v2  ;;  %v2895_v5 = vld [vmem:[#allocation5 + $0x24] ss:$16 sps:$4 sm:$0xff]  }
  0x50   :  { %2035 = vmatpush1.bf16.msra.mxu0 %v2893_v3  ;;  %2240 = vmatpush1.bf16.msra.mxu1 %v2894_v4  ;;  %v2897_v6 = vld [vmem:[#allocation5 + $0x2c] ss:$16 sps:$4 sm:$0xff]   ;;  %v2899_v7 = vld [vmem:[#allocation5 + $0x20] ss:$16 sps:$4 sm:$0xff]   ;;  %v2900_v8 = vld [vmem:[#allocation5 + $0x28] ss:$16 sps:$4 sm:$0xff]  }
  0x51   :  { %2036 = vmatprep.subr.bf16.mxu0 %v2895_v5  ;;  %2241 = vmatprep.subr.bf16.mxu1 %v2897_v6  ;;  %v2901_v9 = vld [vmem:[#allocation5 + $0x44] ss:$16 sps:$4 sm:$0xff]   ;;  %v2903_v10 = vld [vmem:[#allocation5 + $0x4c] ss:$16 sps:$4 sm:$0xff]   ;;  %v2905_v11 = vld [vmem:[#allocation5 + $0x40] ss:$16 sps:$4 sm:$0xff]  }
  0x52   :  { %v2906_v12 = vld [vmem:[#allocation5 + $0x48] ss:$16 sps:$4 sm:$0xff]   ;;  %v2907_v13 = vld [vmem:[#allocation5 + $0x64] ss:$16 sps:$4 sm:$0xff]   ;;  %v2909_v14 = vld [vmem:[#allocation5 + $0x6c] ss:$16 sps:$4 sm:$0xff]  }
  0x53   :  { %v2911_v15 = vld [vmem:[#allocation5 + $0x60] ss:$16 sps:$4 sm:$0xff]   ;;  %v2912_v16 = vld [vmem:[#allocation5 + $0x68] ss:$16 sps:$4 sm:$0xff]   ;;  %v2913_v17 = vld [vmem:[#allocation5 + $0x84] ss:$16 sps:$4 sm:$0xff]  }
  0x54   :  { %2037 = vmatpush1.bf16.msra.mxu0 %v2899_v7  ;;  %2242 = vmatpush1.bf16.msra.mxu1 %v2900_v8  ;;  %v2915_v18 = vld [vmem:[#allocation5 + $0x8c] ss:$16 sps:$4 sm:$0xff]   ;;  %v2917_v19 = vld [vmem:[#allocation5 + $0x80] ss:$16 sps:$4 sm:$0xff]   ;;  %v2918_v20 = vld [vmem:[#allocation5 + $0x88] ss:$16 sps:$4 sm:$0xff]  }
  0x55   :  { %2038 = vmatprep.subr.bf16.mxu0 %v2901_v9  ;;  %2243 = vmatprep.subr.bf16.mxu1 %v2903_v10  ;;  %v2919_v21 = vld [vmem:[#allocation5 + $0xa4] ss:$16 sps:$4 sm:$0xff]   ;;  %v2921_v22 = vld [vmem:[#allocation5 + $0xac] ss:$16 sps:$4 sm:$0xff]   ;;  %v2923_v23 = vld [vmem:[#allocation5 + $0xa0] ss:$16 sps:$4 sm:$0xff]  }
  0x56   :  { %v2924_v24 = vld [vmem:[#allocation5 + $0xa8] ss:$16 sps:$4 sm:$0xff]   ;;  %v2925_v25 = vld [vmem:[#allocation5 + $0xc4] ss:$16 sps:$4 sm:$0xff]   ;;  %v2927_v26 = vld [vmem:[#allocation5 + $0xcc] ss:$16 sps:$4 sm:$0xff]  }
  0x57   :  { %v2929_v27 = vld [vmem:[#allocation5 + $0xc0] ss:$16 sps:$4 sm:$0xff]   ;;  %v2930_v28 = vld [vmem:[#allocation5 + $0xc8] ss:$16 sps:$4 sm:$0xff]   ;;  %v2931_v29 = vld [vmem:[#allocation5 + $0xe4] ss:$16 sps:$4 sm:$0xff]  }
  0x58   :  { %2039 = vmatpush1.bf16.msra.mxu0 %v2905_v11  ;;  %2244 = vmatpush1.bf16.msra.mxu1 %v2906_v12  ;;  %v2933_v30 = vld [vmem:[#allocation5 + $0xec] ss:$16 sps:$4 sm:$0xff]   ;;  %v2935_v31 = vld [vmem:[#allocation5 + $0xe0] ss:$16 sps:$4 sm:$0xff]   ;;  %v2936_v32 = vld [vmem:[#allocation5 + $0xe8] ss:$16 sps:$4 sm:$0xff]  }
  0x59   :  { %2040 = vmatprep.subr.bf16.mxu0 %v2907_v13  ;;  %2245 = vmatprep.subr.bf16.mxu1 %v2909_v14  ;;  %v2937_v33 = vld [vmem:[#allocation5 + $0x104] ss:$16 sps:$4 sm:$0xff]   ;;  %v2939_v34 = vld [vmem:[#allocation5 + $0x10c] ss:$16 sps:$4 sm:$0xff]   ;;  %v2941_v35 = vld [vmem:[#allocation5 + $0x100] ss:$16 sps:$4 sm:$0xff]  }
  0x5a   :  { %v2942_v36 = vld [vmem:[#allocation5 + $0x108] ss:$16 sps:$4 sm:$0xff]   ;;  %v2943_v37 = vld [vmem:[#allocation5 + $0x124] ss:$16 sps:$4 sm:$0xff]   ;;  %v2945_v38 = vld [vmem:[#allocation5 + $0x12c] ss:$16 sps:$4 sm:$0xff]  }
  0x5b   :  { %v3459_v39 = vmov 1983009808   ;;  %v2947_v42 = vld [vmem:[#allocation5 + $0x120] ss:$16 sps:$4 sm:$0xff]   ;;  %v2948_v43 = vld [vmem:[#allocation5 + $0x128] ss:$16 sps:$4 sm:$0xff]  }
  0x5c   :  { %2041 = vmatpush1.bf16.msra.mxu0 %v2911_v15  ;;  %2246 = vmatpush1.bf16.msra.mxu1 %v2912_v16  ;;  %v103_v40 = vunpack.c.l.s4 %v3459_v39  ;;  %v2949_v44 = vld [vmem:[#allocation5 + $0x144] ss:$16 sps:$4 sm:$0xff]   ;;  %v2951_v45 = vld [vmem:[#allocation5 + $0x14c] ss:$16 sps:$4 sm:$0xff]   ;;  %v3541_v47 = vshrl.u32 %v105_v41, 7  ;;  %vm2030_vm0 = vcmask 392192  }
  0x5d   :  { %2042 = vmatprep.subr.bf16.mxu0 %v2913_v17  ;;  %2247 = vmatprep.subr.bf16.mxu1 %v2915_v18  ;;  %v2953_v48 = vld [vmem:[#allocation5 + $0x140] ss:$16 sps:$4 sm:$0xff]   ;;  %v2954_v49 = vld [vmem:[#allocation5 + $0x148] ss:$16 sps:$4 sm:$0xff]   ;;  %v2955_v50 = vld [vmem:[#allocation5 + $0x164] ss:$16 sps:$4 sm:$0xff]  }
  0x5e   :  { %v104_v46 = vunpack.c.0.s8 %v103_v40  ;;  %v2957_v51 = vld [vmem:[#allocation5 + $0x16c] ss:$16 sps:$4 sm:$0xff]   ;;  %v2959_v52 = vld [vmem:[#allocation5 + $0x160] ss:$16 sps:$4 sm:$0xff]   ;;  %v2960_v53 = vld [vmem:[#allocation5 + $0x168] ss:$16 sps:$4 sm:$0xff]  }
  0x5f   :  { %v2961_v55 = vld [vmem:[#allocation5 + $0x184] ss:$16 sps:$4 sm:$0xff]   ;;  %v2988_v57 = vld [vmem:[#allocation3 + $0x28] ss:$20 sps:$4 sm:$0xff]   ;;  %v2965_v61 = vld [vmem:[#allocation5 + $0x180] ss:$16 sps:$4 sm:$0xff]  }
  0x60   :  { %2043 = vmatpush1.bf16.msra.mxu0 %v2917_v19  ;;  %2248 = vmatpush1.bf16.msra.mxu1 %v2918_v20  ;;  %v3544_v54 = vsub.s32 %v104_v46, %v3541_v47  ;;  %v2985_v56 = vld [vmem:[#allocation3] ss:$20 sps:$4 sm:$0xff]   ;;  %v2963_v58 = vld [vmem:[#allocation5 + $0x18c] ss:$16 sps:$4 sm:$0xff]   ;;  %v2966_v62 = vld [vmem:[#allocation5 + $0x188] ss:$16 sps:$4 sm:$0xff]  }
  0x61   :  { %2044 = vmatprep.subr.bf16.mxu0 %v2919_v21  ;;  %2249 = vmatprep.subr.bf16.mxu1 %v2921_v22  ;;  %v2967_v63 = vld [vmem:[#allocation5 + $0x1a4] ss:$16 sps:$4 sm:$0xff]   ;;  %v2969_v1 = vld [vmem:[#allocation5 + $0x1ac] ss:$16 sps:$4 sm:$0xff]   ;;  %v2971_v3 = vld [vmem:[#allocation5 + $0x1a0] ss:$16 sps:$4 sm:$0xff]  }
  0x62   :  { %v108_v59 = vrot.slane %v2985_v56, %v3544_v54  ;;  %v122_v60 = vrot.slane %v2988_v57, %v3544_v54  ;;  %v2972_v4 = vld [vmem:[#allocation5 + $0x1a8] ss:$16 sps:$4 sm:$0xff]   ;;  %v2973_v5 = vld [vmem:[#allocation5 + $0x1c4] ss:$16 sps:$4 sm:$0xff]   ;;  %v2975_v6 = vld [vmem:[#allocation5 + $0x1cc] ss:$16 sps:$4 sm:$0xff]  }
  0x63   :  { %v2987_v7 = vld [vmem:[#allocation3 + $0x4] ss:$20 sps:$4 sm:$0xff]   ;;  %v2990_v8 = vld [vmem:[#allocation3 + $0x2c] ss:$20 sps:$4 sm:$0xff]   ;;  %vm2497_vm1 = vcmask 7168  }
  0x64   :  { %2045 = vmatpush1.bf16.msra.mxu0 %v2923_v23  ;;  %2250 = vmatpush1.bf16.msra.mxu1 %v2924_v24  ;;  %v131_v0 = vcombine.high %v108_v59, %v122_v60  ;;  %v2977_v9 = vld [vmem:[#allocation5 + $0x1c0] ss:$16 sps:$4 sm:$0xff]   ;;  %v2978_v10 = vld [vmem:[#allocation5 + $0x1c8] ss:$16 sps:$4 sm:$0xff]   ;;  %v2979_v11 = vld [vmem:[#allocation5 + $0x1e4] ss:$16 sps:$4 sm:$0xff]   ;;  %v3549_v13 = vrot.slane %v2987_v7, %v3544_v54  ;;  %v3552_v14 = vrot.slane %v2990_v8, %v3544_v54 }
  0x65   :  { %2046 = vmatprep.subr.bf16.mxu0 %v2925_v25  ;;  %2251 = vmatprep.subr.bf16.mxu1 %v2927_v26  ;;  %v2981_v12 = vld [vmem:[#allocation5 + $0x1ec] ss:$16 sps:$4 sm:$0xff]   ;;  %v2983_v15 = vld [vmem:[#allocation5 + $0x1e0] ss:$16 sps:$4 sm:$0xff]   ;;  %v2984_v16 = vld [vmem:[#allocation5 + $0x1e8] ss:$16 sps:$4 sm:$0xff]   ;;  %v130_v17 = vcombine.low %v108_v59, %v122_v60 }
  0x66   :  { %v199_v2 = vpack.c.bf16 %v131_v0, %v131_v0  ;;  %v2993_v18 = vld [vmem:[#allocation5 + $0x204] ss:$16 sps:$4 sm:$0xff]   ;;  %v2996_v19 = vld [vmem:[#allocation5 + $0x20c] ss:$16 sps:$4 sm:$0xff]   ;;  %v133_v20 = vcombine.high %v3549_v13, %v3552_v14  ;;  %v2991_v21 = vld [vmem:[#allocation5 + $0x200] ss:$16 sps:$4 sm:$0xff]  }
  0x67   :  { %v2994_v22 = vld [vmem:[#allocation5 + $0x208] ss:$16 sps:$4 sm:$0xff]   ;;  %v198_v23 = vpack.c.bf16 %v130_v17, %v130_v17  ;;  %v2999_v24 = vld [vmem:[#allocation5 + $0x224] ss:$16 sps:$4 sm:$0xff]   ;;  %v3002_v25 = vld [vmem:[#allocation5 + $0x22c] ss:$16 sps:$4 sm:$0xff]  }
  0x68   :  { %2047 = vmatpush1.bf16.msra.mxu0 %v2929_v27  ;;  %2252 = vmatpush1.bf16.msra.mxu1 %v2930_v28  ;;  %v201_v26 = vpack.c.bf16 %v133_v20, %v133_v20  ;;  %v2997_v27 = vld [vmem:[#allocation5 + $0x220] ss:$16 sps:$4 sm:$0xff]   ;;  %v3000_v28 = vld [vmem:[#allocation5 + $0x228] ss:$16 sps:$4 sm:$0xff]   ;;  %v3023_v41 = vld [vmem:[#allocation5 + $0x2a4] ss:$16 sps:$4 sm:$0xff]  }
  0x69   :  { %2048 = vmatprep.subr.bf16.mxu0 %v2931_v29  ;;  %2253 = vmatprep.subr.bf16.mxu1 %v2933_v30  ;;  %v3005_v29 = vld [vmem:[#allocation5 + $0x244] ss:$16 sps:$4 sm:$0xff]   ;;  %v3008_v30 = vld [vmem:[#allocation5 + $0x24c] ss:$16 sps:$4 sm:$0xff]   ;;  %v3015_v39 = vld [vmem:[#allocation5 + $0x280] ss:$16 sps:$4 sm:$0xff]  }
  0x6a   :  { %2066 = vmatprep.mubr.bf16.mxu0 %v199_v2  ;;  %2271 = vmatprep.mubr.bf16.mxu1 %v199_v2  ;;  %v3018_v40 = vld [vmem:[#allocation5 + $0x288] ss:$16 sps:$4 sm:$0xff]   ;;  %v3032_v46 = vld [vmem:[#allocation5 + $0x2cc] ss:$16 sps:$4 sm:$0xff]   ;;  %v3039_v57 = vld [vmem:[#allocation5 + $0x300] ss:$16 sps:$4 sm:$0xff]  }
  0x6b   :  { %v3044_v56 = vld [vmem:[#allocation5 + $0x30c] ss:$16 sps:$4 sm:$0xff]   ;;  %v3047_v59 = vld [vmem:[#allocation5 + $0x324] ss:$16 sps:$4 sm:$0xff]   ;;  %v3054_v2 = vld [vmem:[#allocation5 + $0x348] ss:$16 sps:$4 sm:$0xff]  }
  0x6c   :  { %2049 = vmatpush1.bf16.msra.mxu0 %v2935_v31  ;;  %2254 = vmatpush1.bf16.msra.mxu1 %v2936_v32  ;;  %v3003_v31 = vld [vmem:[#allocation5 + $0x240] ss:$16 sps:$4 sm:$0xff]   ;;  %v3006_v32 = vld [vmem:[#allocation5 + $0x248] ss:$16 sps:$4 sm:$0xff]   ;;  %v3050_v60 = vld [vmem:[#allocation5 + $0x32c] ss:$16 sps:$4 sm:$0xff]  }
  0x6d   :  { %2050 = vmatprep.subr.bf16.mxu0 %v2937_v33  ;;  %2255 = vmatprep.subr.bf16.mxu1 %v2939_v34  ;;  %v3011_v33 = vld [vmem:[#allocation5 + $0x264] ss:$16 sps:$4 sm:$0xff]   ;;  %v3014_v34 = vld [vmem:[#allocation5 + $0x26c] ss:$16 sps:$4 sm:$0xff]   ;;  %v3078_v20 = vld [vmem:[#allocation5 + $0x3c8] ss:$16 sps:$4 sm:$0xff]  }
  0x6e   :  { %v3056_v0 = vld [vmem:[#allocation5 + $0x34c] ss:$16 sps:$4 sm:$0xff]   ;;  %v3065_v7 = vld [vmem:[#allocation5 + $0x384] ss:$16 sps:$4 sm:$0xff]  }
  0x6f   :  { %v3068_v8 = vld [vmem:[#allocation5 + $0x38c] ss:$16 sps:$4 sm:$0xff]   ;;  %v3077_v17 = vld [vmem:[#allocation5 + $0x3c4] ss:$16 sps:$4 sm:$0xff]  }
  0x70   :  { %2051 = vmatpush1.bf16.msra.mxu0 %v2941_v35  ;;  %2256 = vmatpush1.bf16.msra.mxu1 %v2942_v36  ;;  %v3009_v35 = vld [vmem:[#allocation5 + $0x260] ss:$16 sps:$4 sm:$0xff]   ;;  %v3012_v36 = vld [vmem:[#allocation5 + $0x268] ss:$16 sps:$4 sm:$0xff]  }
  0x71   :  { %2052 = vmatprep.subr.bf16.mxu0 %v2943_v37  ;;  %2257 = vmatprep.subr.bf16.mxu1 %v2945_v38  ;;  %v3017_v37 = vld [vmem:[#allocation5 + $0x284] ss:$16 sps:$4 sm:$0xff]   ;;  %v3020_v38 = vld [vmem:[#allocation5 + $0x28c] ss:$16 sps:$4 sm:$0xff]  }
  0x74   :  { %2053 = vmatpush1.bf16.msra.mxu0 %v2947_v42  ;;  %2258 = vmatpush1.bf16.msra.mxu1 %v2948_v43  ;;  %v3026_v42 = vld [vmem:[#allocation5 + $0x2ac] ss:$16 sps:$4 sm:$0xff]   ;;  %v3021_v43 = vld [vmem:[#allocation5 + $0x2a0] ss:$16 sps:$4 sm:$0xff]  }
  0x75   :  { %2054 = vmatprep.subr.bf16.mxu0 %v2949_v44  ;;  %2259 = vmatprep.subr.bf16.mxu1 %v2951_v45  ;;  %v3024_v44 = vld [vmem:[#allocation5 + $0x2a8] ss:$16 sps:$4 sm:$0xff]   ;;  %v3029_v45 = vld [vmem:[#allocation5 + $0x2c4] ss:$16 sps:$4 sm:$0xff]  }
  0x78   :  { %2055 = vmatpush1.bf16.msra.mxu0 %v2953_v48  ;;  %2260 = vmatpush1.bf16.msra.mxu1 %v2954_v49  ;;  %v3027_v48 = vld [vmem:[#allocation5 + $0x2c0] ss:$16 sps:$4 sm:$0xff]   ;;  %v3030_v49 = vld [vmem:[#allocation5 + $0x2c8] ss:$16 sps:$4 sm:$0xff]  }
  0x79   :  { %2056 = vmatprep.subr.bf16.mxu0 %v2955_v50  ;;  %2261 = vmatprep.subr.bf16.mxu1 %v2957_v51  ;;  %v3035_v50 = vld [vmem:[#allocation5 + $0x2e4] ss:$16 sps:$4 sm:$0xff]   ;;  %v3038_v51 = vld [vmem:[#allocation5 + $0x2ec] ss:$16 sps:$4 sm:$0xff]  }
  0x7c   :  { %2057 = vmatpush1.bf16.msra.mxu0 %v2959_v52  ;;  %2262 = vmatpush1.bf16.msra.mxu1 %v2960_v53  ;;  %v3033_v52 = vld [vmem:[#allocation5 + $0x2e0] ss:$16 sps:$4 sm:$0xff]   ;;  %v3036_v53 = vld [vmem:[#allocation5 + $0x2e8] ss:$16 sps:$4 sm:$0xff]  }
  0x7d   :  { %2058 = vmatprep.subr.bf16.mxu0 %v2961_v55  ;;  %2263 = vmatprep.subr.bf16.mxu1 %v2963_v58  ;;  %v3041_v55 = vld [vmem:[#allocation5 + $0x304] ss:$16 sps:$4 sm:$0xff]   ;;  %v3042_v58 = vld [vmem:[#allocation5 + $0x308] ss:$16 sps:$4 sm:$0xff]  }
  0x80   :  { %2059 = vmatpush1.bf16.msra.mxu0 %v2965_v61  ;;  %2264 = vmatpush1.bf16.msra.mxu1 %v2966_v62  ;;  %v3045_v61 = vld [vmem:[#allocation5 + $0x320] ss:$16 sps:$4 sm:$0xff]   ;;  %v3048_v62 = vld [vmem:[#allocation5 + $0x328] ss:$16 sps:$4 sm:$0xff]  }
  0x81   :  { %2060 = vmatprep.subr.bf16.mxu0 %v2967_v63  ;;  %2265 = vmatprep.subr.bf16.mxu1 %v2969_v1  ;;  %v3053_v63 = vld [vmem:[#allocation5 + $0x344] ss:$16 sps:$4 sm:$0xff]   ;;  %v3051_v1 = vld [vmem:[#allocation5 + $0x340] ss:$16 sps:$4 sm:$0xff]  }
  0x84   :  { %2061 = vmatpush1.bf16.msra.mxu0 %v2971_v3  ;;  %2266 = vmatpush1.bf16.msra.mxu1 %v2972_v4  ;;  %v3059_v3 = vld [vmem:[#allocation5 + $0x364] ss:$16 sps:$4 sm:$0xff]   ;;  %v3062_v4 = vld [vmem:[#allocation5 + $0x36c] ss:$16 sps:$4 sm:$0xff]  }
  0x85   :  { %2062 = vmatprep.subr.bf16.mxu0 %v2973_v5  ;;  %2267 = vmatprep.subr.bf16.mxu1 %v2975_v6  ;;  %v3057_v5 = vld [vmem:[#allocation5 + $0x360] ss:$16 sps:$4 sm:$0xff]   ;;  %v3060_v6 = vld [vmem:[#allocation5 + $0x368] ss:$16 sps:$4 sm:$0xff]  }
  0x88   :  { %2063 = vmatpush1.bf16.msra.mxu0 %v2977_v9  ;;  %2268 = vmatpush1.bf16.msra.mxu1 %v2978_v10  ;;  %v3063_v9 = vld [vmem:[#allocation5 + $0x380] ss:$16 sps:$4 sm:$0xff]   ;;  %v3066_v10 = vld [vmem:[#allocation5 + $0x388] ss:$16 sps:$4 sm:$0xff]  }
  0x89   :  { %2064 = vmatprep.subr.bf16.mxu0 %v2979_v11  ;;  %2269 = vmatprep.subr.bf16.mxu1 %v2981_v12  ;;  %v3071_v11 = vld [vmem:[#allocation5 + $0x3a4] ss:$16 sps:$4 sm:$0xff]   ;;  %v3074_v12 = vld [vmem:[#allocation5 + $0x3ac] ss:$16 sps:$4 sm:$0xff]  }
  0x8c   :  { %2065 = vmatpush1.bf16.msra.mxu0 %v2983_v15  ;;  %2270 = vmatpush1.bf16.msra.mxu1 %v2984_v16  ;;  %v3069_v15 = vld [vmem:[#allocation5 + $0x3a0] ss:$16 sps:$4 sm:$0xff]   ;;  %v3072_v16 = vld [vmem:[#allocation5 + $0x3a8] ss:$16 sps:$4 sm:$0xff]  }
  0x8d   :  { %2075 = vmatprep.subr.bf16.mxu0 %v2993_v18  ;;  %2280 = vmatprep.subr.bf16.mxu1 %v2996_v19  ;;  %v3080_v18 = vld [vmem:[#allocation5 + $0x3cc] ss:$16 sps:$4 sm:$0xff]   ;;  %v3075_v19 = vld [vmem:[#allocation5 + $0x3c0] ss:$16 sps:$4 sm:$0xff]  }
  0x8f   :  { %2067 = vmatmul.mubr.bf16.vlgmr.msra.gmra.mrb[0].mxu0 %v198_v23  ;;  %2272 = vmatmul.mubr.bf16.vlgmr.msra.gmra.mrb[0].mxu1 %v198_v23  ;;  %v3081_v23 = vld [vmem:[#allocation5 + $0x3e0] ss:$16 sps:$4 sm:$0xff]  }
  0x90   :  { %2076 = vmatpush1.bf16.msra.mxu0 %v2991_v21  ;;  %2281 = vmatpush1.bf16.msra.mxu1 %v2994_v22  ;;  %v3083_v21 = vld [vmem:[#allocation5 + $0x3e4] ss:$16 sps:$4 sm:$0xff]   ;;  %v3086_v22 = vld [vmem:[#allocation5 + $0x3ec] ss:$16 sps:$4 sm:$0xff]  }
  0x91   :  { %2077 = vmatprep.subr.bf16.mxu0 %v2999_v24  ;;  %2282 = vmatprep.subr.bf16.mxu1 %v3002_v25  ;;  %v3084_v24 = vld [vmem:[#allocation5 + $0x3e8] ss:$16 sps:$4 sm:$0xff]   ;;  %v132_v25 = vcombine.low %v3549_v13, %v3552_v14  ;;  %v3185_v14 = vld [vmem:[#allocation3 + $0x30] ss:$20 sps:$4 sm:$0xff]  }
  0x92   :  { %2107 = vmatprep.mubr.bf16.mxu0 %v201_v26  ;;  %2312 = vmatprep.mubr.bf16.mxu1 %v201_v26  ;;  %v3089_v26 = vld [vmem:[#allocation5 + $0x404] ss:$16 sps:$4 sm:$0xff]   ;;  %v3183_v13 = vld [vmem:[#allocation3 + $0x8] ss:$20 sps:$4 sm:$0xff]  }
  0x94   :  { %2078 = vmatpush1.bf16.msra.mxu0 %v2997_v27  ;;  %2283 = vmatpush1.bf16.msra.mxu1 %v3000_v28  ;;  %v3092_v27 = vld [vmem:[#allocation5 + $0x40c] ss:$16 sps:$4 sm:$0xff]   ;;  %v3087_v28 = vld [vmem:[#allocation5 + $0x400] ss:$16 sps:$4 sm:$0xff]  }
  0x95   :  { %2079 = vmatprep.subr.bf16.mxu0 %v3005_v29  ;;  %2284 = vmatprep.subr.bf16.mxu1 %v3008_v30  ;;  %v3090_v29 = vld [vmem:[#allocation5 + $0x408] ss:$16 sps:$4 sm:$0xff]   ;;  %v200_v30 = vpack.c.bf16 %v132_v25, %v132_v25  ;;  %v3165_v25 = vld [vmem:[#allocation5 + $0x5a0] ss:$16 sps:$4 sm:$0xff]  }
  0x98   :  { %2080 = vmatpush1.bf16.msra.mxu0 %v3003_v31  ;;  %2285 = vmatpush1.bf16.msra.mxu1 %v3006_v32  ;;  %v3095_v31 = vld [vmem:[#allocation5 + $0x424] ss:$16 sps:$4 sm:$0xff]   ;;  %v3098_v32 = vld [vmem:[#allocation5 + $0x42c] ss:$16 sps:$4 sm:$0xff]  }
  0x99   :  { %2081 = vmatprep.subr.bf16.mxu0 %v3011_v33  ;;  %2286 = vmatprep.subr.bf16.mxu1 %v3014_v34  ;;  %v3093_v33 = vld [vmem:[#allocation5 + $0x420] ss:$16 sps:$4 sm:$0xff]   ;;  %v3096_v34 = vld [vmem:[#allocation5 + $0x428] ss:$16 sps:$4 sm:$0xff]  }
  0x9c   :  { %2082 = vmatpush1.bf16.msra.mxu0 %v3009_v35  ;;  %2287 = vmatpush1.bf16.msra.mxu1 %v3012_v36  ;;  %v3101_v35 = vld [vmem:[#allocation5 + $0x444] ss:$16 sps:$4 sm:$0xff]   ;;  %v3104_v36 = vld [vmem:[#allocation5 + $0x44c] ss:$16 sps:$4 sm:$0xff]  }
  0x9d   :  { %2083 = vmatprep.subr.bf16.mxu0 %v3017_v37  ;;  %2288 = vmatprep.subr.bf16.mxu1 %v3020_v38  ;;  %v3559_v37 = vrot.slane %v3183_v13, %v3544_v54  ;;  %v3562_v38 = vrot.slane %v3185_v14, %v3544_v54 }
  0xa0   :  { %2084 = vmatpush1.bf16.msra.mxu0 %v3015_v39  ;;  %2289 = vmatpush1.bf16.msra.mxu1 %v3018_v40  ;;  %v3099_v39 = vld [vmem:[#allocation5 + $0x440] ss:$16 sps:$4 sm:$0xff]   ;;  %v3102_v40 = vld [vmem:[#allocation5 + $0x448] ss:$16 sps:$4 sm:$0xff]  }
  0xa1   :  { %2085 = vmatprep.subr.bf16.mxu0 %v3023_v41  ;;  %2290 = vmatprep.subr.bf16.mxu1 %v3026_v42  ;;  %v167_v41 = vcombine.high %v3559_v37, %v3562_v38  ;;  %v3107_v42 = vld [vmem:[#allocation5 + $0x464] ss:$16 sps:$4 sm:$0xff]  }
  0xa4   :  { %2086 = vmatpush1.bf16.msra.mxu0 %v3021_v43  ;;  %2291 = vmatpush1.bf16.msra.mxu1 %v3024_v44  ;;  %v3110_v43 = vld [vmem:[#allocation5 + $0x46c] ss:$16 sps:$4 sm:$0xff]   ;;  %v203_v44 = vpack.c.bf16 %v167_v41, %v167_v41 }
  0xa5   :  { %2087 = vmatprep.subr.bf16.mxu0 %v3029_v45  ;;  %2292 = vmatprep.subr.bf16.mxu1 %v3032_v46  ;;  %v3105_v45 = vld [vmem:[#allocation5 + $0x460] ss:$16 sps:$4 sm:$0xff]   ;;  %v3108_v46 = vld [vmem:[#allocation5 + $0x468] ss:$16 sps:$4 sm:$0xff]   ;;  %v3192_v41 = vld [vmem:[#allocation5 + $0x60c] ss:$16 sps:$4 sm:$0xff]  }
  0xa8   :  { %2088 = vmatpush1.bf16.msra.mxu0 %v3027_v48  ;;  %2293 = vmatpush1.bf16.msra.mxu1 %v3030_v49  ;;  %v3113_v48 = vld [vmem:[#allocation5 + $0x484] ss:$16 sps:$4 sm:$0xff]   ;;  %v3116_v49 = vld [vmem:[#allocation5 + $0x48c] ss:$16 sps:$4 sm:$0xff]  }
  0xa9   :  { %2089 = vmatprep.subr.bf16.mxu0 %v3035_v50  ;;  %2294 = vmatprep.subr.bf16.mxu1 %v3038_v51  ;;  %v3111_v50 = vld [vmem:[#allocation5 + $0x480] ss:$16 sps:$4 sm:$0xff]   ;;  %v3114_v51 = vld [vmem:[#allocation5 + $0x488] ss:$16 sps:$4 sm:$0xff]  }
  0xac   :  { %2090 = vmatpush1.bf16.msra.mxu0 %v3033_v52  ;;  %2295 = vmatpush1.bf16.msra.mxu1 %v3036_v53  ;;  %v3119_v52 = vld [vmem:[#allocation5 + $0x4a4] ss:$16 sps:$4 sm:$0xff]   ;;  %v3122_v53 = vld [vmem:[#allocation5 + $0x4ac] ss:$16 sps:$4 sm:$0xff]  }
  0xad   :  { %2091 = vmatprep.subr.bf16.mxu0 %v3041_v55  ;;  %2296 = vmatprep.subr.bf16.mxu1 %v3044_v56  ;;  %v3117_v55 = vld [vmem:[#allocation5 + $0x4a0] ss:$16 sps:$4 sm:$0xff]   ;;  %v3120_v56 = vld [vmem:[#allocation5 + $0x4a8] ss:$16 sps:$4 sm:$0xff]  }
  0xb0   :  { %2092 = vmatpush1.bf16.msra.mxu0 %v3039_v57  ;;  %2297 = vmatpush1.bf16.msra.mxu1 %v3042_v58  ;;  %v3125_v57 = vld [vmem:[#allocation5 + $0x4c4] ss:$16 sps:$4 sm:$0xff]   ;;  %v3128_v58 = vld [vmem:[#allocation5 + $0x4cc] ss:$16 sps:$4 sm:$0xff]  }
  0xb1   :  { %2093 = vmatprep.subr.bf16.mxu0 %v3047_v59  ;;  %2298 = vmatprep.subr.bf16.mxu1 %v3050_v60  ;;  %v3123_v59 = vld [vmem:[#allocation5 + $0x4c0] ss:$16 sps:$4 sm:$0xff]   ;;  %v3126_v60 = vld [vmem:[#allocation5 + $0x4c8] ss:$16 sps:$4 sm:$0xff]  }
  0xb4   :  { %2094 = vmatpush1.bf16.msra.mxu0 %v3045_v61  ;;  %2299 = vmatpush1.bf16.msra.mxu1 %v3048_v62  ;;  %v3131_v61 = vld [vmem:[#allocation5 + $0x4e4] ss:$16 sps:$4 sm:$0xff]   ;;  %v3134_v62 = vld [vmem:[#allocation5 + $0x4ec] ss:$16 sps:$4 sm:$0xff]  }
  0xb5   :  { %2095 = vmatprep.subr.bf16.mxu0 %v3053_v63  ;;  %2300 = vmatprep.subr.bf16.mxu1 %v3056_v0  ;;  %v3129_v63 = vld [vmem:[#allocation5 + $0x4e0] ss:$16 sps:$4 sm:$0xff]   ;;  %v3132_v0 = vld [vmem:[#allocation5 + $0x4e8] ss:$16 sps:$4 sm:$0xff]  }
  0xb8   :  { %2096 = vmatpush1.bf16.msra.mxu0 %v3051_v1  ;;  %2301 = vmatpush1.bf16.msra.mxu1 %v3054_v2  ;;  %v3137_v1 = vld [vmem:[#allocation5 + $0x504] ss:$16 sps:$4 sm:$0xff]   ;;  %v3140_v2 = vld [vmem:[#allocation5 + $0x50c] ss:$16 sps:$4 sm:$0xff]  }
  0xb9   :  { %2097 = vmatprep.subr.bf16.mxu0 %v3059_v3  ;;  %2302 = vmatprep.subr.bf16.mxu1 %v3062_v4  ;;  %v3135_v3 = vld [vmem:[#allocation5 + $0x500] ss:$16 sps:$4 sm:$0xff]   ;;  %v3138_v4 = vld [vmem:[#allocation5 + $0x508] ss:$16 sps:$4 sm:$0xff]  }
  0xbc   :  { %2098 = vmatpush1.bf16.msra.mxu0 %v3057_v5  ;;  %2303 = vmatpush1.bf16.msra.mxu1 %v3060_v6  ;;  %v3143_v5 = vld [vmem:[#allocation5 + $0x524] ss:$16 sps:$4 sm:$0xff]   ;;  %v3146_v6 = vld [vmem:[#allocation5 + $0x52c] ss:$16 sps:$4 sm:$0xff]  }
  0xbd   :  { %2099 = vmatprep.subr.bf16.mxu0 %v3065_v7  ;;  %2304 = vmatprep.subr.bf16.mxu1 %v3068_v8  ;;  %v3141_v7 = vld [vmem:[#allocation5 + $0x520] ss:$16 sps:$4 sm:$0xff]   ;;  %v3144_v8 = vld [vmem:[#allocation5 + $0x528] ss:$16 sps:$4 sm:$0xff]  }
  0xc0   :  { %2100 = vmatpush1.bf16.msra.mxu0 %v3063_v9  ;;  %2305 = vmatpush1.bf16.msra.mxu1 %v3066_v10  ;;  %v3149_v9 = vld [vmem:[#allocation5 + $0x544] ss:$16 sps:$4 sm:$0xff]   ;;  %v3152_v10 = vld [vmem:[#allocation5 + $0x54c] ss:$16 sps:$4 sm:$0xff]  }
  0xc1   :  { %2101 = vmatprep.subr.bf16.mxu0 %v3071_v11  ;;  %2306 = vmatprep.subr.bf16.mxu1 %v3074_v12  ;;  %v3147_v11 = vld [vmem:[#allocation5 + $0x540] ss:$16 sps:$4 sm:$0xff]   ;;  %v3150_v12 = vld [vmem:[#allocation5 + $0x548] ss:$16 sps:$4 sm:$0xff]  }
  0xc4   :  { %2102 = vmatpush1.bf16.msra.mxu0 %v3069_v15  ;;  %2307 = vmatpush1.bf16.msra.mxu1 %v3072_v16  ;;  %v3155_v15 = vld [vmem:[#allocation5 + $0x564] ss:$16 sps:$4 sm:$0xff]   ;;  %v3158_v16 = vld [vmem:[#allocation5 + $0x56c] ss:$16 sps:$4 sm:$0xff]  }
  0xc5   :  { %2103 = vmatprep.subr.bf16.mxu0 %v3077_v17  ;;  %2308 = vmatprep.subr.bf16.mxu1 %v3080_v18  ;;  %v3153_v17 = vld [vmem:[#allocation5 + $0x560] ss:$16 sps:$4 sm:$0xff]   ;;  %v3156_v18 = vld [vmem:[#allocation5 + $0x568] ss:$16 sps:$4 sm:$0xff]  }
  0xc8   :  { %2104 = vmatpush1.bf16.msra.mxu0 %v3075_v19  ;;  %2309 = vmatpush1.bf16.msra.mxu1 %v3078_v20  ;;  %v3161_v19 = vld [vmem:[#allocation5 + $0x584] ss:$16 sps:$4 sm:$0xff]   ;;  %v3164_v20 = vld [vmem:[#allocation5 + $0x58c] ss:$16 sps:$4 sm:$0xff]  }
  0xc9   :  { %2105 = vmatprep.subr.bf16.mxu0 %v3083_v21  ;;  %2310 = vmatprep.subr.bf16.mxu1 %v3086_v22  ;;  %v3159_v21 = vld [vmem:[#allocation5 + $0x580] ss:$16 sps:$4 sm:$0xff]   ;;  %v3162_v22 = vld [vmem:[#allocation5 + $0x588] ss:$16 sps:$4 sm:$0xff]  }
  0xcc   :  { %2106 = vmatpush1.bf16.msra.mxu0 %v3081_v23  ;;  %2311 = vmatpush1.bf16.msra.mxu1 %v3084_v24  ;;  %v3167_v23 = vld [vmem:[#allocation5 + $0x5a4] ss:$16 sps:$4 sm:$0xff]   ;;  %v3170_v24 = vld [vmem:[#allocation5 + $0x5ac] ss:$16 sps:$4 sm:$0xff]  }
  0xcd   :  { %2116 = vmatprep.subr.bf16.mxu0 %v3089_v26  ;;  %2321 = vmatprep.subr.bf16.mxu1 %v3092_v27  ;;  %v3168_v26 = vld [vmem:[#allocation5 + $0x5a8] ss:$16 sps:$4 sm:$0xff]   ;;  %v3173_v27 = vld [vmem:[#allocation5 + $0x5c4] ss:$16 sps:$4 sm:$0xff]  }
  0xcf   :  { %2108 = vmatmul.mubr.bf16.vlgmr.msra.gmra.mrb[0].mxu0 %v200_v30  ;;  %2313 = vmatmul.mubr.bf16.vlgmr.msra.gmra.mrb[0].mxu1 %v200_v30  ;;  %v3284_v30 = vld [vmem:[#allocation3 + $0x34] ss:$20 sps:$4 sm:$0xff]  }
  0xd0   :  { %2117 = vmatpush1.bf16.msra.mxu0 %v3087_v28  ;;  %2322 = vmatpush1.bf16.msra.mxu1 %v3090_v29  ;;  %v3176_v28 = vld [vmem:[#allocation5 + $0x5cc] ss:$16 sps:$4 sm:$0xff]   ;;  %v3570_v14 = vrot.slane %v3284_v30, %v3544_v54 }
  0xd1   :  { %2118 = vmatprep.subr.bf16.mxu0 %v3095_v31  ;;  %2323 = vmatprep.subr.bf16.mxu1 %v3098_v32  ;;  %v3283_v29 = vld [vmem:[#allocation3 + $0xc] ss:$20 sps:$4 sm:$0xff]   ;;  %v3174_v32 = vld [vmem:[#allocation5 + $0x5c8] ss:$16 sps:$4 sm:$0xff]  }
  0xd2   :  { %2148 = vmatprep.mubr.bf16.mxu0 %v203_v44  ;;  %2353 = vmatprep.mubr.bf16.mxu1 %v203_v44  ;;  %v3171_v31 = vld [vmem:[#allocation5 + $0x5c0] ss:$16 sps:$4 sm:$0xff]   ;;  %v3567_v13 = vrot.slane %v3283_v29, %v3544_v54  ;;  %v3190_v44 = vld [vmem:[#allocation5 + $0x608] ss:$16 sps:$4 sm:$0xff]   ;;  %v3261_v29 = vld [vmem:[#allocation5 + $0x784] ss:$16 sps:$4 sm:$0xff]  }
  0xd3   :  { %v3264_v30 = vld [vmem:[#allocation5 + $0x78c] ss:$16 sps:$4 sm:$0xff]  }
  0xd4   :  { %2119 = vmatpush1.bf16.msra.mxu0 %v3093_v33  ;;  %2324 = vmatpush1.bf16.msra.mxu1 %v3096_v34  ;;  %v3179_v33 = vld [vmem:[#allocation5 + $0x5e4] ss:$16 sps:$4 sm:$0xff]   ;;  %v3182_v34 = vld [vmem:[#allocation5 + $0x5ec] ss:$16 sps:$4 sm:$0xff]  }
  0xd5   :  { %2120 = vmatprep.subr.bf16.mxu0 %v3101_v35  ;;  %2325 = vmatprep.subr.bf16.mxu1 %v3104_v36  ;;  %v3177_v35 = vld [vmem:[#allocation5 + $0x5e0] ss:$16 sps:$4 sm:$0xff]   ;;  %v3180_v36 = vld [vmem:[#allocation5 + $0x5e8] ss:$16 sps:$4 sm:$0xff]  }
  0xd8   :  { %2121 = vmatpush1.bf16.msra.mxu0 %v3099_v39  ;;  %2326 = vmatpush1.bf16.msra.mxu1 %v3102_v40  ;;  %v166_v39 = vcombine.low %v3559_v37, %v3562_v38  ;;  %v3189_v40 = vld [vmem:[#allocation5 + $0x604] ss:$16 sps:$4 sm:$0xff]   ;;  %v3193_v37 = vld [vmem:[#allocation5 + $0x620] ss:$16 sps:$4 sm:$0xff]   ;;  %v3196_v38 = vld [vmem:[#allocation5 + $0x628] ss:$16 sps:$4 sm:$0xff]  }
  0xd9   :  { %2122 = vmatprep.subr.bf16.mxu0 %v3107_v42  ;;  %2327 = vmatprep.subr.bf16.mxu1 %v3110_v43  ;;  %v169_v42 = vcombine.high %v3567_v13, %v3570_v14  ;;  %v3187_v43 = vld [vmem:[#allocation5 + $0x600] ss:$16 sps:$4 sm:$0xff]  }
  0xdc   :  { %2123 = vmatpush1.bf16.msra.mxu0 %v3105_v45  ;;  %2328 = vmatpush1.bf16.msra.mxu1 %v3108_v46  ;;  %v202_v45 = vpack.c.bf16 %v166_v39, %v166_v39  ;;  %v3195_v46 = vld [vmem:[#allocation5 + $0x624] ss:$16 sps:$4 sm:$0xff]  }
  0xdd   :  { %2124 = vmatprep.subr.bf16.mxu0 %v3113_v48  ;;  %2329 = vmatprep.subr.bf16.mxu1 %v3116_v49  ;;  %v3198_v48 = vld [vmem:[#allocation5 + $0x62c] ss:$16 sps:$4 sm:$0xff]   ;;  %v205_v49 = vpack.c.bf16 %v169_v42, %v169_v42  ;;  %v3273_v39 = vld [vmem:[#allocation5 + $0x7c4] ss:$16 sps:$4 sm:$0xff]  }
  0xde   :  { %v3352_v42 = vld [vmem:[#allocation3 + $0x38] ss:$20 sps:$4 sm:$0xff]  }
  0xe0   :  { %2125 = vmatpush1.bf16.msra.mxu0 %v3111_v50  ;;  %2330 = vmatpush1.bf16.msra.mxu1 %v3114_v51  ;;  %v3201_v50 = vld [vmem:[#allocation5 + $0x644] ss:$16 sps:$4 sm:$0xff]   ;;  %v3204_v51 = vld [vmem:[#allocation5 + $0x64c] ss:$16 sps:$4 sm:$0xff]  }
  0xe1   :  { %2126 = vmatprep.subr.bf16.mxu0 %v3119_v52  ;;  %2331 = vmatprep.subr.bf16.mxu1 %v3122_v53  ;;  %v3199_v52 = vld [vmem:[#allocation5 + $0x640] ss:$16 sps:$4 sm:$0xff]   ;;  %v3202_v53 = vld [vmem:[#allocation5 + $0x648] ss:$16 sps:$4 sm:$0xff]  }
  0xe4   :  { %2127 = vmatpush1.bf16.msra.mxu0 %v3117_v55  ;;  %2332 = vmatpush1.bf16.msra.mxu1 %v3120_v56  ;;  %v3207_v55 = vld [vmem:[#allocation5 + $0x664] ss:$16 sps:$4 sm:$0xff]   ;;  %v3210_v56 = vld [vmem:[#allocation5 + $0x66c] ss:$16 sps:$4 sm:$0xff]  }
  0xe5   :  { %2128 = vmatprep.subr.bf16.mxu0 %v3125_v57  ;;  %2333 = vmatprep.subr.bf16.mxu1 %v3128_v58  ;;  %v3205_v57 = vld [vmem:[#allocation5 + $0x660] ss:$16 sps:$4 sm:$0xff]   ;;  %v3208_v58 = vld [vmem:[#allocation5 + $0x668] ss:$16 sps:$4 sm:$0xff]  }
  0xe8   :  { %2129 = vmatpush1.bf16.msra.mxu0 %v3123_v59  ;;  %2334 = vmatpush1.bf16.msra.mxu1 %v3126_v60  ;;  %v3213_v59 = vld [vmem:[#allocation5 + $0x684] ss:$16 sps:$4 sm:$0xff]   ;;  %v3216_v60 = vld [vmem:[#allocation5 + $0x68c] ss:$16 sps:$4 sm:$0xff]  }
  0xe9   :  { %2130 = vmatprep.subr.bf16.mxu0 %v3131_v61  ;;  %2335 = vmatprep.subr.bf16.mxu1 %v3134_v62  ;;  %v3211_v61 = vld [vmem:[#allocation5 + $0x680] ss:$16 sps:$4 sm:$0xff]   ;;  %v3214_v62 = vld [vmem:[#allocation5 + $0x688] ss:$16 sps:$4 sm:$0xff]  }
  0xec   :  { %2131 = vmatpush1.bf16.msra.mxu0 %v3129_v63  ;;  %2336 = vmatpush1.bf16.msra.mxu1 %v3132_v0  ;;  %v3219_v63 = vld [vmem:[#allocation5 + $0x6a4] ss:$16 sps:$4 sm:$0xff]   ;;  %v3222_v0 = vld [vmem:[#allocation5 + $0x6ac] ss:$16 sps:$4 sm:$0xff]  }
  0xed   :  { %2132 = vmatprep.subr.bf16.mxu0 %v3137_v1  ;;  %2337 = vmatprep.subr.bf16.mxu1 %v3140_v2  ;;  %v3217_v1 = vld [vmem:[#allocation5 + $0x6a0] ss:$16 sps:$4 sm:$0xff]   ;;  %v3220_v2 = vld [vmem:[#allocation5 + $0x6a8] ss:$16 sps:$4 sm:$0xff]  }
  0xf0   :  { %2133 = vmatpush1.bf16.msra.mxu0 %v3135_v3  ;;  %2338 = vmatpush1.bf16.msra.mxu1 %v3138_v4  ;;  %v3225_v3 = vld [vmem:[#allocation5 + $0x6c4] ss:$16 sps:$4 sm:$0xff]   ;;  %v3228_v4 = vld [vmem:[#allocation5 + $0x6cc] ss:$16 sps:$4 sm:$0xff]  }
  0xf1   :  { %2134 = vmatprep.subr.bf16.mxu0 %v3143_v5  ;;  %2339 = vmatprep.subr.bf16.mxu1 %v3146_v6  ;;  %v3223_v5 = vld [vmem:[#allocation5 + $0x6c0] ss:$16 sps:$4 sm:$0xff]   ;;  %v3226_v6 = vld [vmem:[#allocation5 + $0x6c8] ss:$16 sps:$4 sm:$0xff]  }
  0xf4   :  { %2135 = vmatpush1.bf16.msra.mxu0 %v3141_v7  ;;  %2340 = vmatpush1.bf16.msra.mxu1 %v3144_v8  ;;  %v3231_v7 = vld [vmem:[#allocation5 + $0x6e4] ss:$16 sps:$4 sm:$0xff]   ;;  %v3234_v8 = vld [vmem:[#allocation5 + $0x6ec] ss:$16 sps:$4 sm:$0xff]  }
  0xf5   :  { %2136 = vmatprep.subr.bf16.mxu0 %v3149_v9  ;;  %2341 = vmatprep.subr.bf16.mxu1 %v3152_v10  ;;  %v3229_v9 = vld [vmem:[#allocation5 + $0x6e0] ss:$16 sps:$4 sm:$0xff]   ;;  %v3232_v10 = vld [vmem:[#allocation5 + $0x6e8] ss:$16 sps:$4 sm:$0xff]  }
  0xf8   :  { %2137 = vmatpush1.bf16.msra.mxu0 %v3147_v11  ;;  %2342 = vmatpush1.bf16.msra.mxu1 %v3150_v12  ;;  %v3237_v11 = vld [vmem:[#allocation5 + $0x704] ss:$16 sps:$4 sm:$0xff]   ;;  %v3240_v12 = vld [vmem:[#allocation5 + $0x70c] ss:$16 sps:$4 sm:$0xff]  }
  0xf9   :  { %2138 = vmatprep.subr.bf16.mxu0 %v3155_v15  ;;  %2343 = vmatprep.subr.bf16.mxu1 %v3158_v16  ;;  %v3235_v15 = vld [vmem:[#allocation5 + $0x700] ss:$16 sps:$4 sm:$0xff]   ;;  %v3238_v16 = vld [vmem:[#allocation5 + $0x708] ss:$16 sps:$4 sm:$0xff]  }
  0xfc   :  { %2139 = vmatpush1.bf16.msra.mxu0 %v3153_v17  ;;  %2344 = vmatpush1.bf16.msra.mxu1 %v3156_v18  ;;  %v3243_v17 = vld [vmem:[#allocation5 + $0x724] ss:$16 sps:$4 sm:$0xff]   ;;  %v3246_v18 = vld [vmem:[#allocation5 + $0x72c] ss:$16 sps:$4 sm:$0xff]  }
  0xfd   :  { %2140 = vmatprep.subr.bf16.mxu0 %v3161_v19  ;;  %2345 = vmatprep.subr.bf16.mxu1 %v3164_v20  ;;  %v3241_v19 = vld [vmem:[#allocation5 + $0x720] ss:$16 sps:$4 sm:$0xff]   ;;  %v3244_v20 = vld [vmem:[#allocation5 + $0x728] ss:$16 sps:$4 sm:$0xff]  }
 0x100   :  { %2141 = vmatpush1.bf16.msra.mxu0 %v3159_v21  ;;  %2346 = vmatpush1.bf16.msra.mxu1 %v3162_v22  ;;  %v3249_v21 = vld [vmem:[#allocation5 + $0x744] ss:$16 sps:$4 sm:$0xff]   ;;  %v3252_v22 = vld [vmem:[#allocation5 + $0x74c] ss:$16 sps:$4 sm:$0xff]  }
 0x101   :  { %2142 = vmatprep.subr.bf16.mxu0 %v3167_v23  ;;  %2347 = vmatprep.subr.bf16.mxu1 %v3170_v24  ;;  %v3247_v23 = vld [vmem:[#allocation5 + $0x740] ss:$16 sps:$4 sm:$0xff]   ;;  %v3250_v24 = vld [vmem:[#allocation5 + $0x748] ss:$16 sps:$4 sm:$0xff]  }
 0x104   :  { %2143 = vmatpush1.bf16.msra.mxu0 %v3165_v25  ;;  %2348 = vmatpush1.bf16.msra.mxu1 %v3168_v26  ;;  %v3255_v25 = vld [vmem:[#allocation5 + $0x764] ss:$16 sps:$4 sm:$0xff]   ;;  %v3258_v26 = vld [vmem:[#allocation5 + $0x76c] ss:$16 sps:$4 sm:$0xff]  }
 0x105   :  { %2144 = vmatprep.subr.bf16.mxu0 %v3173_v27  ;;  %2349 = vmatprep.subr.bf16.mxu1 %v3176_v28  ;;  %v3253_v27 = vld [vmem:[#allocation5 + $0x760] ss:$16 sps:$4 sm:$0xff]   ;;  %v3256_v28 = vld [vmem:[#allocation5 + $0x768] ss:$16 sps:$4 sm:$0xff]  }
 0x108   :  { %2145 = vmatpush1.bf16.msra.mxu0 %v3171_v31  ;;  %2350 = vmatpush1.bf16.msra.mxu1 %v3174_v32  ;;  %v3259_v31 = vld [vmem:[#allocation5 + $0x780] ss:$16 sps:$4 sm:$0xff]   ;;  %v3262_v32 = vld [vmem:[#allocation5 + $0x788] ss:$16 sps:$4 sm:$0xff]  }
 0x109   :  { %2146 = vmatprep.subr.bf16.mxu0 %v3179_v33  ;;  %2351 = vmatprep.subr.bf16.mxu1 %v3182_v34  ;;  %v3267_v33 = vld [vmem:[#allocation5 + $0x7a4] ss:$16 sps:$4 sm:$0xff]   ;;  %v3270_v34 = vld [vmem:[#allocation5 + $0x7ac] ss:$16 sps:$4 sm:$0xff]  }
 0x10c   :  { %2147 = vmatpush1.bf16.msra.mxu0 %v3177_v35  ;;  %2352 = vmatpush1.bf16.msra.mxu1 %v3180_v36  ;;  %v3265_v35 = vld [vmem:[#allocation5 + $0x7a0] ss:$16 sps:$4 sm:$0xff]   ;;  %v3268_v36 = vld [vmem:[#allocation5 + $0x7a8] ss:$16 sps:$4 sm:$0xff]  }
 0x10d   :  { %2157 = vmatprep.subr.bf16.mxu0 %v3189_v40  ;;  %2362 = vmatprep.subr.bf16.mxu1 %v3192_v41  ;;  %v3276_v40 = vld [vmem:[#allocation5 + $0x7cc] ss:$16 sps:$4 sm:$0xff]   ;;  %v3351_v41 = vld [vmem:[#allocation3 + $0x10] ss:$20 sps:$4 sm:$0xff]  }
 0x10f   :  { %2149 = vmatmul.mubr.bf16.vlgmr.msra.gmra.mrb[0].mxu0 %v202_v45  ;;  %2354 = vmatmul.mubr.bf16.vlgmr.msra.gmra.mrb[0].mxu1 %v202_v45  ;;  %v3279_v45 = vld [vmem:[#allocation5 + $0x7e4] ss:$16 sps:$4 sm:$0xff]  }
 0x110   :  { %2158 = vmatpush1.bf16.msra.mxu0 %v3187_v43  ;;  %2363 = vmatpush1.bf16.msra.mxu1 %v3190_v44  ;;  %v3271_v43 = vld [vmem:[#allocation5 + $0x7c0] ss:$16 sps:$4 sm:$0xff]   ;;  %v3274_v44 = vld [vmem:[#allocation5 + $0x7c8] ss:$16 sps:$4 sm:$0xff]  }
 0x111   :  { %2159 = vmatprep.subr.bf16.mxu0 %v3195_v46  ;;  %2364 = vmatprep.subr.bf16.mxu1 %v3198_v48  ;;  %v3282_v46 = vld [vmem:[#allocation5 + $0x7ec] ss:$16 sps:$4 sm:$0xff]   ;;  %v3577_v48 = vrot.slane %v3351_v41, %v3544_v54  ;;  %v516_v41 = vsub.s32 1, %v3541_v47 }
 0x112   :  { %2189 = vmatprep.mubr.bf16.mxu0 %v205_v49  ;;  %2394 = vmatprep.mubr.bf16.mxu1 %v205_v49  ;;  %v3580_v49 = vrot.slane %v3352_v42, %v3544_v54  ;;  %v3288_v54 = vld [vmem:[#allocation5 + $0x808] ss:$16 sps:$4 sm:$0xff]   ;;  %v524_v42 = vsub.s32 3, %v3541_v47 }
 0x114   :  { %2160 = vmatpush1.bf16.msra.mxu0 %v3193_v37  ;;  %2365 = vmatpush1.bf16.msra.mxu1 %v3196_v38  ;;  %v168_v37 = vcombine.low %v3567_v13, %v3570_v14  ;;  %v3277_v38 = vld [vmem:[#allocation5 + $0x7e0] ss:$16 sps:$4 sm:$0xff]   ;;  %v3296_v13 = vld [vmem:[#allocation5 + $0x82c] ss:$16 sps:$4 sm:$0xff]  }
 0x115   :  { %2161 = vmatprep.subr.bf16.mxu0 %v3201_v50  ;;  %2366 = vmatprep.subr.bf16.mxu1 %v3204_v51  ;;  %v3280_v50 = vld [vmem:[#allocation5 + $0x7e8] ss:$16 sps:$4 sm:$0xff]   ;;  %v3287_v51 = vld [vmem:[#allocation5 + $0x804] ss:$16 sps:$4 sm:$0xff]  }
 0x118   :  { %2162 = vmatpush1.bf16.msra.mxu0 %v3199_v52  ;;  %2367 = vmatpush1.bf16.msra.mxu1 %v3202_v53  ;;  %v3290_v52 = vld [vmem:[#allocation5 + $0x80c] ss:$16 sps:$4 sm:$0xff]   ;;  %v187_v53 = vcombine.high %v3577_v48, %v3580_v49 }
 0x119   :  { %2163 = vmatprep.subr.bf16.mxu0 %v3207_v55  ;;  %2368 = vmatprep.subr.bf16.mxu1 %v3210_v56  ;;  %v204_v55 = vpack.c.bf16 %v168_v37, %v168_v37  ;;  %v3285_v56 = vld [vmem:[#allocation5 + $0x800] ss:$16 sps:$4 sm:$0xff]  }
 0x11a   :  { %v207_v14 = vpack.c.bf16 %v187_v53, %v187_v53 }
 0x11c   :  { %2164 = vmatpush1.bf16.msra.mxu0 %v3205_v57  ;;  %2369 = vmatpush1.bf16.msra.mxu1 %v3208_v58  ;;  %v3293_v57 = vld [vmem:[#allocation5 + $0x824] ss:$16 sps:$4 sm:$0xff]   ;;  %v3291_v58 = vld [vmem:[#allocation5 + $0x820] ss:$16 sps:$4 sm:$0xff]  }
 0x11d   :  { %2165 = vmatprep.subr.bf16.mxu0 %v3213_v59  ;;  %2370 = vmatprep.subr.bf16.mxu1 %v3216_v60  ;;  %v3294_v59 = vld [vmem:[#allocation5 + $0x828] ss:$16 sps:$4 sm:$0xff]   ;;  %v3299_v60 = vld [vmem:[#allocation5 + $0x844] ss:$16 sps:$4 sm:$0xff]  }
 0x120   :  { %2166 = vmatpush1.bf16.msra.mxu0 %v3211_v61  ;;  %2371 = vmatpush1.bf16.msra.mxu1 %v3214_v62  ;;  %v3302_v61 = vld [vmem:[#allocation5 + $0x84c] ss:$16 sps:$4 sm:$0xff]   ;;  %v3297_v62 = vld [vmem:[#allocation5 + $0x840] ss:$16 sps:$4 sm:$0xff]  }
 0x121   :  { %2167 = vmatprep.subr.bf16.mxu0 %v3219_v63  ;;  %2372 = vmatprep.subr.bf16.mxu1 %v3222_v0  ;;  %v3300_v63 = vld [vmem:[#allocation5 + $0x848] ss:$16 sps:$4 sm:$0xff]   ;;  %v3305_v0 = vld [vmem:[#allocation5 + $0x864] ss:$16 sps:$4 sm:$0xff]  }
 0x124   :  { %2168 = vmatpush1.bf16.msra.mxu0 %v3217_v1  ;;  %2373 = vmatpush1.bf16.msra.mxu1 %v3220_v2  ;;  %v3308_v1 = vld [vmem:[#allocation5 + $0x86c] ss:$16 sps:$4 sm:$0xff]   ;;  %v3303_v2 = vld [vmem:[#allocation5 + $0x860] ss:$16 sps:$4 sm:$0xff]  }
 0x125   :  { %2169 = vmatprep.subr.bf16.mxu0 %v3225_v3  ;;  %2374 = vmatprep.subr.bf16.mxu1 %v3228_v4  ;;  %v3306_v3 = vld [vmem:[#allocation5 + $0x868] ss:$16 sps:$4 sm:$0xff]   ;;  %v3311_v4 = vld [vmem:[#allocation5 + $0x884] ss:$16 sps:$4 sm:$0xff]  }
 0x128   :  { %2170 = vmatpush1.bf16.msra.mxu0 %v3223_v5  ;;  %2375 = vmatpush1.bf16.msra.mxu1 %v3226_v6  ;;  %v3314_v5 = vld [vmem:[#allocation5 + $0x88c] ss:$16 sps:$4 sm:$0xff]   ;;  %v3309_v6 = vld [vmem:[#allocation5 + $0x880] ss:$16 sps:$4 sm:$0xff]  }
 0x129   :  { %2171 = vmatprep.subr.bf16.mxu0 %v3231_v7  ;;  %2376 = vmatprep.subr.bf16.mxu1 %v3234_v8  ;;  %v3312_v7 = vld [vmem:[#allocation5 + $0x888] ss:$16 sps:$4 sm:$0xff]   ;;  %v3317_v8 = vld [vmem:[#allocation5 + $0x8a4] ss:$16 sps:$4 sm:$0xff]  }
 0x12c   :  { %2172 = vmatpush1.bf16.msra.mxu0 %v3229_v9  ;;  %2377 = vmatpush1.bf16.msra.mxu1 %v3232_v10  ;;  %v3320_v9 = vld [vmem:[#allocation5 + $0x8ac] ss:$16 sps:$4 sm:$0xff]   ;;  %v3315_v10 = vld [vmem:[#allocation5 + $0x8a0] ss:$16 sps:$4 sm:$0xff]  }
 0x12d   :  { %2173 = vmatprep.subr.bf16.mxu0 %v3237_v11  ;;  %2378 = vmatprep.subr.bf16.mxu1 %v3240_v12  ;;  %v3318_v11 = vld [vmem:[#allocation5 + $0x8a8] ss:$16 sps:$4 sm:$0xff]   ;;  %v3323_v12 = vld [vmem:[#allocation5 + $0x8c4] ss:$16 sps:$4 sm:$0xff]  }
 0x130   :  { %2174 = vmatpush1.bf16.msra.mxu0 %v3235_v15  ;;  %2379 = vmatpush1.bf16.msra.mxu1 %v3238_v16  ;;  %v3326_v15 = vld [vmem:[#allocation5 + $0x8cc] ss:$16 sps:$4 sm:$0xff]   ;;  %v3321_v16 = vld [vmem:[#allocation5 + $0x8c0] ss:$16 sps:$4 sm:$0xff]  }
 0x131   :  { %2175 = vmatprep.subr.bf16.mxu0 %v3243_v17  ;;  %2380 = vmatprep.subr.bf16.mxu1 %v3246_v18  ;;  %v3324_v17 = vld [vmem:[#allocation5 + $0x8c8] ss:$16 sps:$4 sm:$0xff]   ;;  %v3329_v18 = vld [vmem:[#allocation5 + $0x8e4] ss:$16 sps:$4 sm:$0xff]  }
 0x134   :  { %2176 = vmatpush1.bf16.msra.mxu0 %v3241_v19  ;;  %2381 = vmatpush1.bf16.msra.mxu1 %v3244_v20  ;;  %v3332_v19 = vld [vmem:[#allocation5 + $0x8ec] ss:$16 sps:$4 sm:$0xff]   ;;  %v3327_v20 = vld [vmem:[#allocation5 + $0x8e0] ss:$16 sps:$4 sm:$0xff]  }
 0x135   :  { %2177 = vmatprep.subr.bf16.mxu0 %v3249_v21  ;;  %2382 = vmatprep.subr.bf16.mxu1 %v3252_v22  ;;  %v3330_v21 = vld [vmem:[#allocation5 + $0x8e8] ss:$16 sps:$4 sm:$0xff]   ;;  %v3335_v22 = vld [vmem:[#allocation5 + $0x904] ss:$16 sps:$4 sm:$0xff]  }
 0x138   :  { %2178 = vmatpush1.bf16.msra.mxu0 %v3247_v23  ;;  %2383 = vmatpush1.bf16.msra.mxu1 %v3250_v24  ;;  %v3338_v23 = vld [vmem:[#allocation5 + $0x90c] ss:$16 sps:$4 sm:$0xff]   ;;  %v3333_v24 = vld [vmem:[#allocation5 + $0x900] ss:$16 sps:$4 sm:$0xff]  }
 0x139   :  { %2179 = vmatprep.subr.bf16.mxu0 %v3255_v25  ;;  %2384 = vmatprep.subr.bf16.mxu1 %v3258_v26  ;;  %v3336_v25 = vld [vmem:[#allocation5 + $0x908] ss:$16 sps:$4 sm:$0xff]   ;;  %v3341_v26 = vld [vmem:[#allocation5 + $0x924] ss:$16 sps:$4 sm:$0xff]  }
 0x13c   :  { %2180 = vmatpush1.bf16.msra.mxu0 %v3253_v27  ;;  %2385 = vmatpush1.bf16.msra.mxu1 %v3256_v28  ;;  %v3344_v27 = vld [vmem:[#allocation5 + $0x92c] ss:$16 sps:$4 sm:$0xff]   ;;  %v3339_v28 = vld [vmem:[#allocation5 + $0x920] ss:$16 sps:$4 sm:$0xff]  }
 0x13d   :  { %2181 = vmatprep.subr.bf16.mxu0 %v3261_v29  ;;  %2386 = vmatprep.subr.bf16.mxu1 %v3264_v30  ;;  %v3342_v29 = vld [vmem:[#allocation5 + $0x928] ss:$16 sps:$4 sm:$0xff]   ;;  %v3347_v30 = vld [vmem:[#allocation5 + $0x944] ss:$16 sps:$4 sm:$0xff]  }
 0x140   :  { %2182 = vmatpush1.bf16.msra.mxu0 %v3259_v31  ;;  %2387 = vmatpush1.bf16.msra.mxu1 %v3262_v32  ;;  %v3350_v31 = vld [vmem:[#allocation5 + $0x94c] ss:$16 sps:$4 sm:$0xff]   ;;  %v186_v32 = vcombine.low %v3577_v48, %v3580_v49  ;;  %v2452_v49 = vld [vmem:[#allocation8] sm:$0xf] }
 0x141   :  { %2183 = vmatprep.subr.bf16.mxu0 %v3267_v33  ;;  %2388 = vmatprep.subr.bf16.mxu1 %v3270_v34  ;;  %v3345_v33 = vld [vmem:[#allocation5 + $0x940] ss:$16 sps:$4 sm:$0xff]   ;;  %v3348_v34 = vld [vmem:[#allocation5 + $0x948] ss:$16 sps:$4 sm:$0xff]  }
 0x144   :  { %2184 = vmatpush1.bf16.msra.mxu0 %v3265_v35  ;;  %2389 = vmatpush1.bf16.msra.mxu1 %v3268_v36  ;;  %v206_v35 = vpack.c.bf16 %v186_v32, %v186_v32  ;;  %v512_v36 = vsub.s32 0, %v3541_v47 }
 0x145   :  { %2185 = vmatprep.subr.bf16.mxu0 %v3273_v39  ;;  %2390 = vmatprep.subr.bf16.mxu1 %v3276_v40  ;;  %v520_v39 = vsub.s32 2, %v3541_v47  ;;  %v508_v40 = vld [vmem:[#allocation7] sm:$0xf] }
 0x148   :  { %2186 = vmatpush1.bf16.msra.mxu0 %v3271_v43  ;;  %2391 = vmatpush1.bf16.msra.mxu1 %v3274_v44  ;;  %v513_v43 = vrot.slane %v508_v40, %v512_v36  ;;  %v521_v44 = vrot.slane %v508_v40, %v520_v39 }
 0x149   :  { %2187 = vmatprep.subr.bf16.mxu0 %v3279_v45  ;;  %2392 = vmatprep.subr.bf16.mxu1 %v3282_v46  ;;  %v517_v45 = vrot.slane %v508_v40, %v516_v41  ;;  %v525_v46 = vrot.slane %v508_v40, %v524_v42 }
 0x14c   :  { %2188 = vmatpush1.bf16.msra.mxu0 %v3277_v38  ;;  %2393 = vmatpush1.bf16.msra.mxu1 %v3280_v50 }
 0x14d   :  { %2198 = vmatprep.subr.bf16.mxu0 %v3287_v51  ;;  %2403 = vmatprep.subr.bf16.mxu1 %v3290_v52 }
 0x14f   :  { %2190 = vmatmul.mubr.bf16.vlgmr.msra.gmra.mrb[0].mxu0 %v204_v55  ;;  %2395 = vmatmul.mubr.bf16.vlgmr.msra.gmra.mrb[0].mxu1 %v204_v55 }
 0x150   :  { %2199 = vmatpush1.bf16.msra.mxu0 %v3285_v56  ;;  %2404 = vmatpush1.bf16.msra.mxu1 %v3288_v54 }
 0x151   :  { %2200 = vmatprep.subr.bf16.mxu0 %v3293_v57  ;;  %2405 = vmatprep.subr.bf16.mxu1 %v3296_v13  ;;  %v2457_v13 = vrot.slane %v2452_v49, %v512_v36 }
 0x152   :  { %2841 = vmatprep.mubr.msk.bf16.mxu0 %vm2030_vm0, %v207_v14  ;;  %2842 = vmatprep.mubr.msk.bf16.mxu1 %vm2030_vm0, %v207_v14 }
 0x154   :  { %2201 = vmatpush1.bf16.msra.mxu0 %v3291_v58  ;;  %2406 = vmatpush1.bf16.msra.mxu1 %v3294_v59 }
 0x155   :  { %2202 = vmatprep.subr.bf16.mxu0 %v3299_v60  ;;  %2407 = vmatprep.subr.bf16.mxu1 %v3302_v61  ;;  %v2461_v60 = vrot.slane %v2452_v49, %v516_v41 }
 0x158   :  { %2203 = vmatpush1.bf16.msra.mxu0 %v3297_v62  ;;  %2408 = vmatpush1.bf16.msra.mxu1 %v3300_v63 }
 0x159   :  { %2204 = vmatprep.subr.bf16.mxu0 %v3305_v0  ;;  %2409 = vmatprep.subr.bf16.mxu1 %v3308_v1  ;;  %v2465_v1 = vrot.slane %v2452_v49, %v520_v39 }
 0x15c   :  { %2205 = vmatpush1.bf16.msra.mxu0 %v3303_v2  ;;  %2410 = vmatpush1.bf16.msra.mxu1 %v3306_v3 }
 0x15d   :  { %2206 = vmatprep.subr.bf16.mxu0 %v3311_v4  ;;  %2411 = vmatprep.subr.bf16.mxu1 %v3314_v5  ;;  %v2469_v5 = vrot.slane %v2452_v49, %v524_v42 }
 0x160   :  { %2207 = vmatpush1.bf16.msra.mxu0 %v3309_v6  ;;  %2412 = vmatpush1.bf16.msra.mxu1 %v3312_v7 }
 0x161   :  { %2208 = vmatprep.subr.bf16.mxu0 %v3317_v8  ;;  %2413 = vmatprep.subr.bf16.mxu1 %v3320_v9 }
 0x164   :  { %2209 = vmatpush1.bf16.msra.mxu0 %v3315_v10  ;;  %2414 = vmatpush1.bf16.msra.mxu1 %v3318_v11  ;;  %v2843_v11 = vld [vmem:[#allocation2] ss:$0 sm:$0xff] }
 0x165   :  { %2210 = vmatprep.subr.bf16.mxu0 %v3323_v12  ;;  %2415 = vmatprep.subr.bf16.mxu1 %v3326_v15 }
 0x168   :  { %2211 = vmatpush1.bf16.msra.mxu0 %v3321_v16  ;;  %2416 = vmatpush1.bf16.msra.mxu1 %v3324_v17 }
 0x169   :  { %2212 = vmatprep.subr.bf16.mxu0 %v3329_v18  ;;  %2417 = vmatprep.subr.bf16.mxu1 %v3332_v19 }
 0x16c   :  { %2213 = vmatpush1.bf16.msra.mxu0 %v3327_v20  ;;  %2418 = vmatpush1.bf16.msra.mxu1 %v3330_v21 }
 0x16d   :  { %2214 = vmatprep.subr.bf16.mxu0 %v3335_v22  ;;  %2419 = vmatprep.subr.bf16.mxu1 %v3338_v23 }
 0x170   :  { %2215 = vmatpush1.bf16.msra.mxu0 %v3333_v24  ;;  %2420 = vmatpush1.bf16.msra.mxu1 %v3336_v25 }
 0x171   :  { %2216 = vmatprep.subr.bf16.mxu0 %v3341_v26  ;;  %2421 = vmatprep.subr.bf16.mxu1 %v3344_v27 }
 0x174   :  { %2217 = vmatpush1.bf16.msra.mxu0 %v3339_v28  ;;  %2422 = vmatpush1.bf16.msra.mxu1 %v3342_v29 }
 0x175   :  { %2218 = vmatprep.subr.bf16.mxu0 %v3347_v30  ;;  %2423 = vmatprep.subr.bf16.mxu1 %v3350_v31 }
 0x178   :  { %2219 = vmatpush1.bf16.msra.mxu0 %v3345_v33  ;;  %2424 = vmatpush1.bf16.msra.mxu1 %v3348_v34 }
 0x17b   :  { %2231 = vmatmul.mubr.bf16.vlgmr.msra.gmra.mrb[0].mxu0 %v206_v35  ;;  %2436 = vmatmul.mubr.bf16.vlgmr.msra.gmra.mrb[0].mxu1 %v206_v35 }
 0x24e   :  { %v2232_v48 = vpop.f32.mrb[0].mxu0  ;;  %v2437_v37 = vpop.f32.mrb[0].mxu1 }
 0x24f   :  { %v2844_v38 = vadd.f32 %v2232_v48, %v513_v43  ;;  %v2846_v50 = vadd.f32 %v2437_v37, %v521_v44  ;;  %v2234_v51 = vpop.f32.mrb[1].mxu0  ;;  %v2439_v52 = vpop.f32.mrb[1].mxu1 }
 0x250   :  { %v2845_v53 = vadd.f32 %v2234_v51, %v517_v45  ;;  %v2847_v55 = vadd.f32 %v2439_v52, %v525_v46  ;;  %v2236_v56 = vpop.f32.mrb[2].mxu0  ;;  %v2441_v54 = vpop.f32.mrb[2].mxu1 }
 0x251   :  { %v2444_v57 = vmul.f32 0.2, %v2844_v38  ;;  %v2446_v14 = vmul.f32 0.2, %v2846_v50  ;;  %v2237_v58 = vpop.f32.mrb[3].mxu0  ;;  %v2442_v47 = vpop.f32.mrb[3].mxu1 }
 0x252   :  { %v2445_v59 = vmul.f32 0.2, %v2845_v53  ;;  %v2447_v61 = vmul.f32 0.2, %v2847_v55 }
 0x253   :  { %v2448_v62 = vmax.f32 %v2844_v38, %v2444_v57  ;;  %v2450_v63 = vmax.f32 %v2846_v50, %v2446_v14 }
 0x254   :  { %v2449_v0 = vmax.f32 %v2845_v53, %v2445_v59  ;;  %v2451_v4 = vmax.f32 %v2847_v55, %v2447_v61 }
 0x255   :  { %v2474_v2 = vmul.f32 %v2457_v13, %v2448_v62  ;;  %v2476_v6 = vmul.f32 %v2465_v1, %v2450_v63 }
 0x256   :  { %v2475_v3 = vmul.f32 %v2461_v60, %v2449_v0  ;;  %v2477_v8 = vmul.f32 %v2469_v5, %v2451_v4 }
 0x258   :  { %v2478_v7 = vadd.f32 %v2475_v3, %v2474_v2 }
 0x25a   :  { %v2479_v9 = vadd.f32 %v2478_v7, %v2476_v6 }
 0x25c   :  { %v2480_v10 = vadd.f32 %v2479_v9, %v2477_v8 }
 0x25e   :  { %2481 = vadd.xlane.f32.xlu0 %v2480_v10 }
 0x2eb   :  { %v2482_v12 = vpop.xlane.xlu0 %2481 }
 0x2ec   :  { %v2490_v15 = vadd.f32 %v2843_v11, %v2482_v12 }
 0x2ee   :  { %v2491_v16 = vsub.f32 0.0, %v2490_v15 }
 0x2f0   :  { %v2492_v17 = vmul.f32 1.442695, %v2491_v16 }
 0x2f2   :  { %3353 = vpow2.f32 %v2492_v17 }
 0x2fc   :  { %v3354_v18 = vpop.eup %3353 }
 0x2fd   :  { %v2494_v19 = vadd.f32 1.0, %v3354_v18 }
 0x2ff   :  { %3355 = vrcp.f32 %v2494_v19 }
 0x309   :  { %v3356_v20 = vpop.eup %3355 }
 0x30a   :  { %2498 = vst.msk [vmem:[#allocation10] sm:$0xff] %vm2497_vm1, %v3356_v20 }
 0x311   :  { %v2516_v21 = vld [vmem:[#allocation10] sm:$0x3] }
 0x312   :  { %2517 = vst [vmem:[%s3600_s5] sm:$0x3] %v2516_v21 }
 0x313   :  { %2534 = vsyncpa [#allocation4], 1 }
 0x314   :  { %2535 = vsyncpa [#allocation6], 1 }
 0x315   :  { %2536 = vsyncpa [#allocation9], 1 }

</bundles_post_ra>
